<compile_context>
chip_gen: v7x
topology: tpu7x:2x2x1
jax: 0.10.0
libtpu: 0.0.40
codegen_flags: <defaults>
</compile_context>

<pallas_src>
import math
import functools

import jax
import jax.numpy as jnp
from jax.experimental import pallas as pl
from jax.experimental.pallas import tpu as pltpu


# ----------------------------- model config ---------------------------------
NTOKEN = 50
D_MODEL = 32
NHEAD = 4
D_HID = 64
NLAYERS = 2
SEQ = 8
BATCH = 2
LN_EPS = 1e-5
VPAD = 128        # decoder output padded to one full lane tile (dense stores)
NEG_BIG = -1e30   # finite "minus infinity" for all mask sources


# ----------------------------- Pallas kernel --------------------------------
def _layernorm(x, gamma, beta):
    mean = jnp.mean(x, axis=-1, keepdims=True)
    var = jnp.mean(jnp.square(x - mean), axis=-1, keepdims=True)
    inv = jax.lax.rsqrt(var + LN_EPS)
    return (x - mean) * inv * gamma + beta


def fused_forward_kernel(tok_ref, mask_ref, emb_ref, pe_ref,
                         wqkv_ref, bqkv_ref, wo_ref, bo_ref,
                         w1_ref, b1_ref, w2_ref, b2_ref,
                         g1_ref, be1_ref, g2_ref, be2_ref,
                         decw_ref, decb_ref, o_ref, ctx_ref,
                         *, nhead, nlayers):
    f32 = jnp.float32
    sb = tok_ref.shape[0]
    vocab, d = emb_ref.shape
    dh = d // nhead

    # ---- embedding lookup as a one-hot matmul (gather-free, MXU friendly) ---
    # sqrt(d_model) already folded into emb_ref at pack time.
    tok = tok_ref[...]                                             # (SB, 1) int32
    vocab_ids = jax.lax.broadcasted_iota(jnp.int32, (sb, vocab), 1)
    onehot = (vocab_ids == tok).astype(f32)                        # (SB, V)
    x = jnp.dot(onehot, emb_ref[...], preferred_element_type=f32)  # (SB, D)

    # ---- positional encoding (dropout is identity at inference) ----
    x = x + pe_ref[...]

    mask = mask_ref[...]                                           # (SB, SB), finite

    for l in range(nlayers):
        # ---- self attention: single fused QKV projection ----
        qkv = jnp.dot(x, wqkv_ref[l], preferred_element_type=f32) + bqkv_ref[l]
        q = qkv[:, :d]            # already pre-scaled by 1/sqrt(dh) at pack time
        k = qkv[:, d:2 * d]
        v = qkv[:, 2 * d:]

        for h in range(nhead):
            sl = slice(h * dh, (h + 1) * dh)
            qh = q[:, sl]
            kh = k[:, sl]
            vh = v[:, sl]
            # contraction on the last dim of both operands -> no explicit K^T
            s = jax.lax.dot_general(qh, kh, (((1,), (1,)), ((), ())),
                                    preferred_element_type=f32) + mask
            s = s - jnp.max(s, axis=-1, keepdims=True)
            p = jnp.exp(s)
            inv = pl.reciprocal(jnp.sum(p, axis=-1, keepdims=True), approx=True)
            p = p * inv
            # write this head's context into its lane slice of the scratch buffer
            ctx_ref[:, sl] = jnp.dot(p, vh, preferred_element_type=f32)

        # ONE output projection over all heads
        attn = jnp.dot(ctx_ref[...], wo_ref[l], preferred_element_type=f32) + bo_ref[l]

        # ---- residual + norm1 (post-norm) ----
        y = _layernorm(x + attn, g1_ref[l], be1_ref[l])

        # ---- feed-forward ----
        ff = jnp.dot(y, w1_ref[l], preferred_element_type=f32) + b1_ref[l]
        ff = jnp.maximum(ff, 0.0)                                  # relu
        ff = jnp.dot(ff, w2_ref[l], preferred_element_type=f32) + b2_ref[l]

        # ---- residual + norm2 ----
        x = _layernorm(y + ff, g2_ref[l], be2_ref[l])

    # ---- decoder projection (padded to VPAD lanes -> lane-dense store) ----
    logits = jnp.dot(x, decw_ref[...], preferred_element_type=f32) + decb_ref[...]
    o_ref[...] = logits.astype(o_ref.dtype)


# ----------------------------- wrapper ---------------------------------------
def toy_transformer_forward(src_tokens, src_mask, params):
    """src_tokens: (S, B) int32, src_mask: (S, S) additive float mask.
    Returns (S, B, ntoken) -- same convention as the PyTorch module."""
    S, B = src_tokens.shape
    SB = S * B
    nlayers = params["wqkv"].shape[0]

    # Flatten tokens seq-major (row = s*B + b), matching the final reshape.
    tok = src_tokens.reshape(SB, 1).astype(jnp.int32)
    # PE broadcast over batch -> single (SB, D) add inside the kernel.
    pe_flat = jnp.broadcast_to(params["pe"][:S, None, :],
                               (S, B, D_MODEL)).reshape(SB, D_MODEL)
    # Combined additive mask over the flattened token axis:
    # user/causal mask (clamped to a finite NEG_BIG) plus cross-batch blocking.
    user_mask = jnp.maximum(src_mask.astype(jnp.float32), NEG_BIG)
    block = jnp.where(jnp.eye(B, dtype=jnp.bool_), 0.0, NEG_BIG).astype(jnp.float32)
    mask_full = (user_mask[:, None, :, None] + block[None, :, None, :]
                 ).reshape(SB, SB)

    vmem_spec = pl.BlockSpec(memory_space=pltpu.MemorySpace.VMEM)
    out = pl.pallas_call(
        functools.partial(fused_forward_kernel, nhead=NHEAD, nlayers=nlayers),
        out_shape=jax.ShapeDtypeStruct((SB, VPAD), jnp.float32),
        in_specs=[vmem_spec] * 18,
        out_specs=vmem_spec,
        scratch_shapes=[pltpu.VMEM((SB, D_MODEL), jnp.float32)],
    )(tok, mask_full, params["emb"], pe_flat,
      params["wqkv"], params["bqkv"],
      params["wo"], params["bo"],
      params["w1"], params["b1"], params["w2"], params["b2"],
      params["g1"], params["be1"], params["g2"], params["be2"],
      params["dec_w"], params["dec_b"])
    return out[:, :NTOKEN].reshape(S, B, NTOKEN)


# ----------------------------- parameter packing -----------------------------
def pack_params(p):
    """Torch-layout params -> kernel layout:
       * emb pre-scaled by sqrt(D_MODEL)
       * fused (D, 3D) QKV weight per layer, Q block pre-scaled by 1/sqrt(Dh)
       * pre-transposed matmul layouts (x @ W), stacked over layers
       * decoder padded to VPAD lanes."""
    D = D_MODEL
    dh = D // NHEAD
    qscale = 1.0 / math.sqrt(dh)
    layers = p["layers"]
    stack = lambda f: jnp.stack([f(lp) for lp in layers], axis=0)

    def wqkv_of(lp):
        wq = lp["win"][:D, :].T * qscale          # (D, D)
        wk = lp["win"][D:2 * D, :].T
        wv = lp["win"][2 * D:, :].T
        return jnp.concatenate([wq, wk, wv], axis=1)   # (D, 3D)

    def bqkv_of(lp):
        b = lp["bin"]                             # (1, 3D)
        return jnp.concatenate([b[:, :D] * qscale, b[:, D:]], axis=1)

    dec_w = jnp.zeros((D, VPAD), jnp.float32).at[:, :NTOKEN].set(p["dec_w"].T)
    dec_b = jnp.zeros((1, VPAD), jnp.float32).at[:, :NTOKEN].set(p["dec_b"])
    return {
        "emb": p["emb"] * math.sqrt(D),                      # sqrt(d_model) folded
        "pe": p["pe"][:, 0, :],                              # (max_len, D)
        "wqkv": stack(wqkv_of),                              # (L, D, 3D)
        "bqkv": stack(bqkv_of),                              # (L, 1, 3D)
        "wo": stack(lambda lp: lp["wout"].T),                # (L, D, D)
        "bo": stack(lambda lp: lp["bout"]),
        "w1": stack(lambda lp: lp["w1"].T),                  # (L, D, D_HID)
        "b1": stack(lambda lp: lp["b1"]),
        "w2": stack(lambda lp: lp["w2"].T),                  # (L, D_HID, D)
        "b2": stack(lambda lp: lp["b2"]),
        "g1": stack(lambda lp: lp["g1"]),
        "be1": stack(lambda lp: lp["be1"]),
        "g2": stack(lambda lp: lp["g2"]),
        "be2": stack(lambda lp: lp["be2"]),
        "dec_w": dec_w,
        "dec_b": dec_b,
    }


# ----------------------------- reference (pure JAX) ---------------------------
def reference_forward(src_tokens, src_mask, params):
    S, B = src_tokens.shape
    x = params["emb"][src_tokens] * math.sqrt(D_MODEL)
    x = x + params["pe"][:S]
    x = jnp.transpose(x, (1, 0, 2))  # (B, S, D)
    Dh = D_MODEL // NHEAD
    for p in params["layers"]:
        qkv = jnp.einsum("bsd,ed->bse", x, p["win"]) + p["bin"][0]
        q, k, v = jnp.split(qkv, 3, axis=-1)
        q = q.reshape(B, S, NHEAD, Dh) / math.sqrt(Dh)
        k = k.reshape(B, S, NHEAD, Dh)
        v = v.reshape(B, S, NHEAD, Dh)
        s = jnp.einsum("bqhd,bkhd->bhqk", q, k) + src_mask
        pr = jax.nn.softmax(s, axis=-1)
        a = jnp.einsum("bhqk,bkhd->bqhd", pr, v).reshape(B, S, D_MODEL)
        a = jnp.einsum("bsd,ed->bse", a, p["wout"]) + p["bout"][0]
        y = x + a
        mean = jnp.mean(y, -1, keepdims=True)
        var = jnp.mean((y - mean) ** 2, -1, keepdims=True)
        y = (y - mean) * jax.lax.rsqrt(var + LN_EPS) * p["g1"][0] + p["be1"][0]
        ff = jax.nn.relu(jnp.einsum("bsd,hd->bsh", y, p["w1"]) + p["b1"][0])
        ff = jnp.einsum("bsh,dh->bsd", ff, p["w2"]) + p["b2"][0]
        z = y + ff
        mean = jnp.mean(z, -1, keepdims=True)
        var = jnp.mean((z - mean) ** 2, -1, keepdims=True)
        x = (z - mean) * jax.lax.rsqrt(var + LN_EPS) * p["g2"][0] + p["be2"][0]
    x = jnp.transpose(x, (1, 0, 2))
    return jnp.einsum("sbd,vd->sbv", x, params["dec_w"]) + params["dec_b"][0]


# ----------------------------- parameter init ---------------------------------
def init_params(key):
    keys = jax.random.split(key, 8 + NLAYERS * 8)
    ki = iter(keys)

    def uni(k, shape, r):
        return jax.random.uniform(k, shape, jnp.float32, minval=-r, maxval=r)

    # positional encoding buffer (same formula as PositionalEncoding)
    position = jnp.arange(SEQ, dtype=jnp.float32)[:, None]
    div_term = jnp.exp(jnp.arange(0, D_MODEL, 2, dtype=jnp.float32)
                       * (-math.log(10000.0) / D_MODEL))
    pe = jnp.zeros((SEQ, 1, D_MODEL), jnp.float32)
    pe = pe.at[:, 0, 0::2].set(jnp.sin(position * div_term))
    pe = pe.at[:, 0, 1::2].set(jnp.cos(position * div_term))

    params = {
        "emb": uni(next(ki), (NTOKEN, D_MODEL), 0.1),
        "pe": pe,
        "dec_w": uni(next(ki), (NTOKEN, D_MODEL), 0.1),
        "dec_b": jnp.zeros((1, NTOKEN), jnp.float32),
        "layers": [],
    }
    for _ in range(NLAYERS):
        xav = math.sqrt(6.0 / (D_MODEL + 3 * D_MODEL))
        layer = {
            "win": uni(next(ki), (3 * D_MODEL, D_MODEL), xav),
            "bin": jnp.zeros((1, 3 * D_MODEL), jnp.float32),
            "wout": uni(next(ki), (D_MODEL, D_MODEL), 1.0 / math.sqrt(D_MODEL)),
            "bout": jnp.zeros((1, D_MODEL), jnp.float32),
            "w1": uni(next(ki), (D_HID, D_MODEL), 1.0 / math.sqrt(D_MODEL)),
            "b1": uni(next(ki), (1, D_HID), 1.0 / math.sqrt(D_MODEL)),
            "w2": uni(next(ki), (D_MODEL, D_HID), 1.0 / math.sqrt(D_HID)),
            "b2": uni(next(ki), (1, D_MODEL), 1.0 / math.sqrt(D_HID)),
            "g1": jnp.ones((1, D_MODEL), jnp.float32),
            "be1": jnp.zeros((1, D_MODEL), jnp.float32),
            "g2": jnp.ones((1, D_MODEL), jnp.float32),
            "be2": jnp.zeros((1, D_MODEL), jnp.float32),
        }
        params["layers"].append(layer)
    return params


# ----------------------------- main -------------------------------------------
if __name__ == "__main__":
    key = jax.random.PRNGKey(0)
    pkey, tkey = jax.random.split(key)
    torch_params = init_params(pkey)
    kparams = pack_params(torch_params)

    # deterministic token ids (S, B) and a causal (square-subsequent) src_mask
    src_tokens = jax.random.randint(tkey, (SEQ, BATCH), 0, NTOKEN, dtype=jnp.int32)
    src_mask = jnp.where(
        jnp.triu(jnp.ones((SEQ, SEQ), jnp.bool_), k=1),
        jnp.float32(-jnp.inf), jnp.float32(0.0))

    fwd = jax.jit(toy_transformer_forward)
    out = jax.block_until_ready(fwd(src_tokens, src_mask, kparams))

    ref = jax.block_until_ready(reference_forward(src_tokens, src_mask, torch_params))
    assert out.shape == (SEQ, BATCH, NTOKEN), out.shape
    # Tolerance covers the EUP approximate-reciprocal softmax denominator.
    assert jnp.allclose(out, ref, atol=2e-3, rtol=2e-3), (
        float(jnp.max(jnp.abs(out - ref))))

    print("KERNEL_OK")
</pallas_src>

<mosaic_0001>
module attributes {stable_mosaic.version = 11 : i64} {
  func.func @fused_forward_kernel(%arg0: memref<16x1xi32, #tpu.memory_space<vmem>>, %arg1: memref<16x16xf32, #tpu.memory_space<vmem>>, %arg2: memref<50x32xf32, #tpu.memory_space<vmem>>, %arg3: memref<16x32xf32, #tpu.memory_space<vmem>>, %arg4: memref<2x32x96xf32, #tpu.memory_space<vmem>>, %arg5: memref<2x1x96xf32, #tpu.memory_space<vmem>>, %arg6: memref<2x32x32xf32, #tpu.memory_space<vmem>>, %arg7: memref<2x1x32xf32, #tpu.memory_space<vmem>>, %arg8: memref<2x32x64xf32, #tpu.memory_space<vmem>>, %arg9: memref<2x1x64xf32, #tpu.memory_space<vmem>>, %arg10: memref<2x64x32xf32, #tpu.memory_space<vmem>>, %arg11: memref<2x1x32xf32, #tpu.memory_space<vmem>>, %arg12: memref<2x1x32xf32, #tpu.memory_space<vmem>>, %arg13: memref<2x1x32xf32, #tpu.memory_space<vmem>>, %arg14: memref<2x1x32xf32, #tpu.memory_space<vmem>>, %arg15: memref<2x1x32xf32, #tpu.memory_space<vmem>>, %arg16: memref<32x128xf32, #tpu.memory_space<vmem>>, %arg17: memref<1x128xf32, #tpu.memory_space<vmem>>, %arg18: memref<16x128xf32, #tpu.memory_space<vmem>>, %arg19: memref<16x32xf32, #tpu.memory_space<vmem>>) attributes {dimension_semantics = [], scalar_prefetch = 0 : i64, scratch_operands = 1 : i64, tpu.core_type = #tpu.core_type<tc>} {
    %c0 = arith.constant 0 : index
    %c0_0 = arith.constant 0 : index
    %0 = vector.load %arg0[%c0, %c0_0] : memref<16x1xi32, #tpu.memory_space<vmem>>, vector<16x1xi32>
    %1 = tpu.iota {dimensions = array<i32: 1>} : vector<16x50xi32>
    %2 = vector.broadcast %0 : vector<16x1xi32> to vector<16x50xi32>
    %3 = arith.cmpi eq, %1, %2 : vector<16x50xi32>
    %4 = arith.extui %3 : vector<16x50xi1> to vector<16x50xi32>
    %5 = arith.sitofp %4 : vector<16x50xi32> to vector<16x50xf32>
    %c0_1 = arith.constant 0 : index
    %c0_2 = arith.constant 0 : index
    %6 = vector.load %arg2[%c0_1, %c0_2] : memref<50x32xf32, #tpu.memory_space<vmem>>, vector<50x32xf32>
    %cst = arith.constant dense<0.000000e+00> : vector<16x32xf32>
    %7 = tpu.matmul %5, %6, %cst {dimension_numbers = #tpu.dot_dimension_numbers<[1], [0], [0], [1], [0, 0, 1, 1], [], []>} : vector<16x50xf32>, vector<50x32xf32>, vector<16x32xf32> -> vector<16x32xf32>
    %c0_3 = arith.constant 0 : index
    %c0_4 = arith.constant 0 : index
    %8 = vector.load %arg3[%c0_3, %c0_4] : memref<16x32xf32, #tpu.memory_space<vmem>>, vector<16x32xf32>
    %9 = arith.addf %7, %8 : vector<16x32xf32>
    %c0_5 = arith.constant 0 : index
    %c0_6 = arith.constant 0 : index
    %10 = vector.load %arg1[%c0_5, %c0_6] : memref<16x16xf32, #tpu.memory_space<vmem>>, vector<16x16xf32>
    %c0_7 = arith.constant 0 : index
    %c0_8 = arith.constant 0 : index
    %c0_9 = arith.constant 0 : index
    %11 = vector.load %arg4[%c0_7, %c0_8, %c0_9] : memref<2x32x96xf32, #tpu.memory_space<vmem>>, vector<1x32x96xf32>
    %12 = vector.shape_cast %11 : vector<1x32x96xf32> to vector<32x96xf32>
    %cst_10 = arith.constant dense<0.000000e+00> : vector<16x96xf32>
    %13 = tpu.matmul %9, %12, %cst_10 {dimension_numbers = #tpu.dot_dimension_numbers<[1], [0], [0], [1], [0, 0, 1, 1], [], []>} : vector<16x32xf32>, vector<32x96xf32>, vector<16x96xf32> -> vector<16x96xf32>
    %c0_11 = arith.constant 0 : index
    %c0_12 = arith.constant 0 : index
    %c0_13 = arith.constant 0 : index
    %14 = vector.load %arg5[%c0_11, %c0_12, %c0_13] : memref<2x1x96xf32, #tpu.memory_space<vmem>>, vector<1x1x96xf32>
    %15 = vector.shape_cast %14 : vector<1x1x96xf32> to vector<1x96xf32>
    %16 = vector.broadcast %15 : vector<1x96xf32> to vector<16x96xf32>
    %17 = arith.addf %13, %16 : vector<16x96xf32>
    %18 = vector.extract_strided_slice %17 {offsets = [0, 0], sizes = [16, 32], strides = [1, 1]} : vector<16x96xf32> to vector<16x32xf32>
    %19 = vector.extract_strided_slice %17 {offsets = [0, 32], sizes = [16, 32], strides = [1, 1]} : vector<16x96xf32> to vector<16x32xf32>
    %20 = vector.extract_strided_slice %17 {offsets = [0, 64], sizes = [16, 32], strides = [1, 1]} : vector<16x96xf32> to vector<16x32xf32>
    %21 = vector.extract_strided_slice %18 {offsets = [0, 0], sizes = [16, 8], strides = [1, 1]} : vector<16x32xf32> to vector<16x8xf32>
    %22 = vector.extract_strided_slice %19 {offsets = [0, 0], sizes = [16, 8], strides = [1, 1]} : vector<16x32xf32> to vector<16x8xf32>
    %23 = vector.extract_strided_slice %20 {offsets = [0, 0], sizes = [16, 8], strides = [1, 1]} : vector<16x32xf32> to vector<16x8xf32>
    %cst_14 = arith.constant dense<0.000000e+00> : vector<16x16xf32>
    %24 = tpu.matmul %21, %22, %cst_14 {dimension_numbers = #tpu.dot_dimension_numbers<[1], [1], [0], [0], [0, 0, 1, 0], [], []>} : vector<16x8xf32>, vector<16x8xf32>, vector<16x16xf32> -> vector<16x16xf32>
    %25 = arith.addf %24, %10 : vector<16x16xf32>
    %cst_15 = arith.constant dense<0xFF800000> : vector<16xf32>
    %26 = vector.multi_reduction <maximumf>, %25, %cst_15 [1] : vector<16x16xf32> to vector<16xf32>
    %27 = vector.shape_cast %26 : vector<16xf32> to vector<16x1xf32>
    %28 = vector.broadcast %27 : vector<16x1xf32> to vector<16x16xf32>
    %29 = arith.subf %25, %28 : vector<16x16xf32>
    %30 = math.exp %29 : vector<16x16xf32>
    %cst_16 = arith.constant dense<0.000000e+00> : vector<16xf32>
    %31 = vector.multi_reduction <add>, %30, %cst_16 [1] : vector<16x16xf32> to vector<16xf32>
    %32 = vector.shape_cast %31 : vector<16xf32> to vector<16x1xf32>
    %33 = tpu.reciprocal %32 {approx = true} : vector<16x1xf32> -> vector<16x1xf32>
    %34 = vector.broadcast %33 : vector<16x1xf32> to vector<16x16xf32>
    %35 = arith.mulf %30, %34 : vector<16x16xf32>
    %cst_17 = arith.constant dense<0.000000e+00> : vector<16x8xf32>
    %36 = tpu.matmul %35, %23, %cst_17 {dimension_numbers = #tpu.dot_dimension_numbers<[1], [0], [0], [1], [0, 0, 1, 1], [], []>} : vector<16x16xf32>, vector<16x8xf32>, vector<16x8xf32> -> vector<16x8xf32>
    %c0_18 = arith.constant 0 : index
    %c0_19 = arith.constant 0 : index
    %37 = vector.load %arg19[%c0_18, %c0_19] : memref<16x32xf32, #tpu.memory_space<vmem>>, vector<16x8xf32>
    tpu.vector_store %arg19[%c0_18, %c0_19], %36 {strides = array<i32>} : memref<16x32xf32, #tpu.memory_space<vmem>>, vector<16x8xf32>,
    %38 = vector.extract_strided_slice %18 {offsets = [0, 8], sizes = [16, 8], strides = [1, 1]} : vector<16x32xf32> to vector<16x8xf32>
    %39 = vector.extract_strided_slice %19 {offsets = [0, 8], sizes = [16, 8], strides = [1, 1]} : vector<16x32xf32> to vector<16x8xf32>
    %40 = vector.extract_strided_slice %20 {offsets = [0, 8], sizes = [16, 8], strides = [1, 1]} : vector<16x32xf32> to vector<16x8xf32>
    %cst_20 = arith.constant dense<0.000000e+00> : vector<16x16xf32>
    %41 = tpu.matmul %38, %39, %cst_20 {dimension_numbers = #tpu.dot_dimension_numbers<[1], [1], [0], [0], [0, 0, 1, 0], [], []>} : vector<16x8xf32>, vector<16x8xf32>, vector<16x16xf32> -> vector<16x16xf32>
    %42 = arith.addf %41, %10 : vector<16x16xf32>
    %cst_21 = arith.constant dense<0xFF800000> : vector<16xf32>
    %43 = vector.multi_reduction <maximumf>, %42, %cst_21 [1] : vector<16x16xf32> to vector<16xf32>
    %44 = vector.shape_cast %43 : vector<16xf32> to vector<16x1xf32>
    %45 = vector.broadcast %44 : vector<16x1xf32> to vector<16x16xf32>
    %46 = arith.subf %42, %45 : vector<16x16xf32>
    %47 = math.exp %46 : vector<16x16xf32>
    %cst_22 = arith.constant dense<0.000000e+00> : vector<16xf32>
    %48 = vector.multi_reduction <add>, %47, %cst_22 [1] : vector<16x16xf32> to vector<16xf32>
    %49 = vector.shape_cast %48 : vector<16xf32> to vector<16x1xf32>
    %50 = tpu.reciprocal %49 {approx = true} : vector<16x1xf32> -> vector<16x1xf32>
    %51 = vector.broadcast %50 : vector<16x1xf32> to vector<16x16xf32>
    %52 = arith.mulf %47, %51 : vector<16x16xf32>
    %cst_23 = arith.constant dense<0.000000e+00> : vector<16x8xf32>
    %53 = tpu.matmul %52, %40, %cst_23 {dimension_numbers = #tpu.dot_dimension_numbers<[1], [0], [0], [1], [0, 0, 1, 1], [], []>} : vector<16x16xf32>, vector<16x8xf32>, vector<16x8xf32> -> vector<16x8xf32>
    %c0_24 = arith.constant 0 : index
    %c8 = arith.constant 8 : index
    %54 = vector.load %arg19[%c0_24, %c8] : memref<16x32xf32, #tpu.memory_space<vmem>>, vector<16x8xf32>
    tpu.vector_store %arg19[%c0_24, %c8], %53 {strides = array<i32>} : memref<16x32xf32, #tpu.memory_space<vmem>>, vector<16x8xf32>,
    %55 = vector.extract_strided_slice %18 {offsets = [0, 16], sizes = [16, 8], strides = [1, 1]} : vector<16x32xf32> to vector<16x8xf32>
    %56 = vector.extract_strided_slice %19 {offsets = [0, 16], sizes = [16, 8], strides = [1, 1]} : vector<16x32xf32> to vector<16x8xf32>
    %57 = vector.extract_strided_slice %20 {offsets = [0, 16], sizes = [16, 8], strides = [1, 1]} : vector<16x32xf32> to vector<16x8xf32>
    %cst_25 = arith.constant dense<0.000000e+00> : vector<16x16xf32>
    %58 = tpu.matmul %55, %56, %cst_25 {dimension_numbers = #tpu.dot_dimension_numbers<[1], [1], [0], [0], [0, 0, 1, 0], [], []>} : vector<16x8xf32>, vector<16x8xf32>, vector<16x16xf32> -> vector<16x16xf32>
    %59 = arith.addf %58, %10 : vector<16x16xf32>
    %cst_26 = arith.constant dense<0xFF800000> : vector<16xf32>
    %60 = vector.multi_reduction <maximumf>, %59, %cst_26 [1] : vector<16x16xf32> to vector<16xf32>
    %61 = vector.shape_cast %60 : vector<16xf32> to vector<16x1xf32>
    %62 = vector.broadcast %61 : vector<16x1xf32> to vector<16x16xf32>
    %63 = arith.subf %59, %62 : vector<16x16xf32>
    %64 = math.exp %63 : vector<16x16xf32>
    %cst_27 = arith.constant dense<0.000000e+00> : vector<16xf32>
    %65 = vector.multi_reduction <add>, %64, %cst_27 [1] : vector<16x16xf32> to vector<16xf32>
    %66 = vector.shape_cast %65 : vector<16xf32> to vector<16x1xf32>
    %67 = tpu.reciprocal %66 {approx = true} : vector<16x1xf32> -> vector<16x1xf32>
    %68 = vector.broadcast %67 : vector<16x1xf32> to vector<16x16xf32>
    %69 = arith.mulf %64, %68 : vector<16x16xf32>
    %cst_28 = arith.constant dense<0.000000e+00> : vector<16x8xf32>
    %70 = tpu.matmul %69, %57, %cst_28 {dimension_numbers = #tpu.dot_dimension_numbers<[1], [0], [0], [1], [0, 0, 1, 1], [], []>} : vector<16x16xf32>, vector<16x8xf32>, vector<16x8xf32> -> vector<16x8xf32>
    %c0_29 = arith.constant 0 : index
    %c16 = arith.constant 16 : index
    %71 = vector.load %arg19[%c0_29, %c16] : memref<16x32xf32, #tpu.memory_space<vmem>>, vector<16x8xf32>
    tpu.vector_store %arg19[%c0_29, %c16], %70 {strides = array<i32>} : memref<16x32xf32, #tpu.memory_space<vmem>>, vector<16x8xf32>,
    %72 = vector.extract_strided_slice %18 {offsets = [0, 24], sizes = [16, 8], strides = [1, 1]} : vector<16x32xf32> to vector<16x8xf32>
    %73 = vector.extract_strided_slice %19 {offsets = [0, 24], sizes = [16, 8], strides = [1, 1]} : vector<16x32xf32> to vector<16x8xf32>
    %74 = vector.extract_strided_slice %20 {offsets = [0, 24], sizes = [16, 8], strides = [1, 1]} : vector<16x32xf32> to vector<16x8xf32>
    %cst_30 = arith.constant dense<0.000000e+00> : vector<16x16xf32>
    %75 = tpu.matmul %72, %73, %cst_30 {dimension_numbers = #tpu.dot_dimension_numbers<[1], [1], [0], [0], [0, 0, 1, 0], [], []>} : vector<16x8xf32>, vector<16x8xf32>, vector<16x16xf32> -> vector<16x16xf32>
    %76 = arith.addf %75, %10 : vector<16x16xf32>
    %cst_31 = arith.constant dense<0xFF800000> : vector<16xf32>
    %77 = vector.multi_reduction <maximumf>, %76, %cst_31 [1] : vector<16x16xf32> to vector<16xf32>
    %78 = vector.shape_cast %77 : vector<16xf32> to vector<16x1xf32>
    %79 = vector.broadcast %78 : vector<16x1xf32> to vector<16x16xf32>
    %80 = arith.subf %76, %79 : vector<16x16xf32>
    %81 = math.exp %80 : vector<16x16xf32>
    %cst_32 = arith.constant dense<0.000000e+00> : vector<16xf32>
    %82 = vector.multi_reduction <add>, %81, %cst_32 [1] : vector<16x16xf32> to vector<16xf32>
    %83 = vector.shape_cast %82 : vector<16xf32> to vector<16x1xf32>
    %84 = tpu.reciprocal %83 {approx = true} : vector<16x1xf32> -> vector<16x1xf32>
    %85 = vector.broadcast %84 : vector<16x1xf32> to vector<16x16xf32>
    %86 = arith.mulf %81, %85 : vector<16x16xf32>
    %cst_33 = arith.constant dense<0.000000e+00> : vector<16x8xf32>
    %87 = tpu.matmul %86, %74, %cst_33 {dimension_numbers = #tpu.dot_dimension_numbers<[1], [0], [0], [1], [0, 0, 1, 1], [], []>} : vector<16x16xf32>, vector<16x8xf32>, vector<16x8xf32> -> vector<16x8xf32>
    %c0_34 = arith.constant 0 : index
    %c24 = arith.constant 24 : index
    %88 = vector.load %arg19[%c0_34, %c24] : memref<16x32xf32, #tpu.memory_space<vmem>>, vector<16x8xf32>
    tpu.vector_store %arg19[%c0_34, %c24], %87 {strides = array<i32>} : memref<16x32xf32, #tpu.memory_space<vmem>>, vector<16x8xf32>,
    %c0_35 = arith.constant 0 : index
    %c0_36 = arith.constant 0 : index
    %89 = vector.load %arg19[%c0_35, %c0_36] : memref<16x32xf32, #tpu.memory_space<vmem>>, vector<16x32xf32>
    %c0_37 = arith.constant 0 : index
    %c0_38 = arith.constant 0 : index
    %c0_39 = arith.constant 0 : index
    %90 = vector.load %arg6[%c0_37, %c0_38, %c0_39] : memref<2x32x32xf32, #tpu.memory_space<vmem>>, vector<1x32x32xf32>
    %91 = vector.shape_cast %90 : vector<1x32x32xf32> to vector<32x32xf32>
    %cst_40 = arith.constant dense<0.000000e+00> : vector<16x32xf32>
    %92 = tpu.matmul %89, %91, %cst_40 {dimension_numbers = #tpu.dot_dimension_numbers<[1], [0], [0], [1], [0, 0, 1, 1], [], []>} : vector<16x32xf32>, vector<32x32xf32>, vector<16x32xf32> -> vector<16x32xf32>
    %c0_41 = arith.constant 0 : index
    %c0_42 = arith.constant 0 : index
    %c0_43 = arith.constant 0 : index
    %93 = vector.load %arg7[%c0_41, %c0_42, %c0_43] : memref<2x1x32xf32, #tpu.memory_space<vmem>>, vector<1x1x32xf32>
    %94 = vector.shape_cast %93 : vector<1x1x32xf32> to vector<1x32xf32>
    %95 = vector.broadcast %94 : vector<1x32xf32> to vector<16x32xf32>
    %96 = arith.addf %92, %95 : vector<16x32xf32>
    %97 = arith.addf %9, %96 : vector<16x32xf32>
    %c0_44 = arith.constant 0 : index
    %c0_45 = arith.constant 0 : index
    %c0_46 = arith.constant 0 : index
    %98 = vector.load %arg12[%c0_44, %c0_45, %c0_46] : memref<2x1x32xf32, #tpu.memory_space<vmem>>, vector<1x1x32xf32>
    %99 = vector.shape_cast %98 : vector<1x1x32xf32> to vector<1x32xf32>
    %c0_47 = arith.constant 0 : index
    %c0_48 = arith.constant 0 : index
    %c0_49 = arith.constant 0 : index
    %100 = vector.load %arg13[%c0_47, %c0_48, %c0_49] : memref<2x1x32xf32, #tpu.memory_space<vmem>>, vector<1x1x32xf32>
    %101 = vector.shape_cast %100 : vector<1x1x32xf32> to vector<1x32xf32>
    %cst_50 = arith.constant dense<0.000000e+00> : vector<16xf32>
    %102 = vector.multi_reduction <add>, %97, %cst_50 [1] : vector<16x32xf32> to vector<16xf32>
    %103 = vector.shape_cast %102 : vector<16xf32> to vector<16x1xf32>
    %cst_51 = arith.constant 3.200000e+01 : f32
    %104 = vector.broadcast %cst_51 : f32 to vector<16x1xf32>
    %105 = arith.divf %103, %104 : vector<16x1xf32>
    %106 = vector.broadcast %105 : vector<16x1xf32> to vector<16x32xf32>
    %107 = arith.subf %97, %106 : vector<16x32xf32>
    %108 = arith.mulf %107, %107 : vector<16x32xf32>
    %cst_52 = arith.constant dense<0.000000e+00> : vector<16xf32>
    %109 = vector.multi_reduction <add>, %108, %cst_52 [1] : vector<16x32xf32> to vector<16xf32>
    %110 = vector.shape_cast %109 : vector<16xf32> to vector<16x1xf32>
    %cst_53 = arith.constant 3.200000e+01 : f32
    %111 = vector.broadcast %cst_53 : f32 to vector<16x1xf32>
    %112 = arith.divf %110, %111 : vector<16x1xf32>
    %cst_54 = arith.constant 9.99999974E-6 : f32
    %113 = vector.broadcast %cst_54 : f32 to vector<16x1xf32>
    %114 = arith.addf %112, %113 : vector<16x1xf32>
    %115 = math.rsqrt %114 : vector<16x1xf32>
    %116 = vector.broadcast %105 : vector<16x1xf32> to vector<16x32xf32>
    %117 = arith.subf %97, %116 : vector<16x32xf32>
    %118 = vector.broadcast %115 : vector<16x1xf32> to vector<16x32xf32>
    %119 = arith.mulf %117, %118 : vector<16x32xf32>
    %120 = vector.broadcast %99 : vector<1x32xf32> to vector<16x32xf32>
    %121 = arith.mulf %119, %120 : vector<16x32xf32>
    %122 = vector.broadcast %101 : vector<1x32xf32> to vector<16x32xf32>
    %123 = arith.addf %121, %122 : vector<16x32xf32>
    %c0_55 = arith.constant 0 : index
    %c0_56 = arith.constant 0 : index
    %c0_57 = arith.constant 0 : index
    %124 = vector.load %arg8[%c0_55, %c0_56, %c0_57] : memref<2x32x64xf32, #tpu.memory_space<vmem>>, vector<1x32x64xf32>
    %125 = vector.shape_cast %124 : vector<1x32x64xf32> to vector<32x64xf32>
    %cst_58 = arith.constant dense<0.000000e+00> : vector<16x64xf32>
    %126 = tpu.matmul %123, %125, %cst_58 {dimension_numbers = #tpu.dot_dimension_numbers<[1], [0], [0], [1], [0, 0, 1, 1], [], []>} : vector<16x32xf32>, vector<32x64xf32>, vector<16x64xf32> -> vector<16x64xf32>
    %c0_59 = arith.constant 0 : index
    %c0_60 = arith.constant 0 : index
    %c0_61 = arith.constant 0 : index
    %127 = vector.load %arg9[%c0_59, %c0_60, %c0_61] : memref<2x1x64xf32, #tpu.memory_space<vmem>>, vector<1x1x64xf32>
    %128 = vector.shape_cast %127 : vector<1x1x64xf32> to vector<1x64xf32>
    %129 = vector.broadcast %128 : vector<1x64xf32> to vector<16x64xf32>
    %130 = arith.addf %126, %129 : vector<16x64xf32>
    %cst_62 = arith.constant 0.000000e+00 : f32
    %131 = vector.broadcast %cst_62 : f32 to vector<16x64xf32>
    %132 = arith.maximumf %130, %131 : vector<16x64xf32>
    %c0_63 = arith.constant 0 : index
    %c0_64 = arith.constant 0 : index
    %c0_65 = arith.constant 0 : index
    %133 = vector.load %arg10[%c0_63, %c0_64, %c0_65] : memref<2x64x32xf32, #tpu.memory_space<vmem>>, vector<1x64x32xf32>
    %134 = vector.shape_cast %133 : vector<1x64x32xf32> to vector<64x32xf32>
    %cst_66 = arith.constant dense<0.000000e+00> : vector<16x32xf32>
    %135 = tpu.matmul %132, %134, %cst_66 {dimension_numbers = #tpu.dot_dimension_numbers<[1], [0], [0], [1], [0, 0, 1, 1], [], []>} : vector<16x64xf32>, vector<64x32xf32>, vector<16x32xf32> -> vector<16x32xf32>
    %c0_67 = arith.constant 0 : index
    %c0_68 = arith.constant 0 : index
    %c0_69 = arith.constant 0 : index
    %136 = vector.load %arg11[%c0_67, %c0_68, %c0_69] : memref<2x1x32xf32, #tpu.memory_space<vmem>>, vector<1x1x32xf32>
    %137 = vector.shape_cast %136 : vector<1x1x32xf32> to vector<1x32xf32>
    %138 = vector.broadcast %137 : vector<1x32xf32> to vector<16x32xf32>
    %139 = arith.addf %135, %138 : vector<16x32xf32>
    %140 = arith.addf %123, %139 : vector<16x32xf32>
    %c0_70 = arith.constant 0 : index
    %c0_71 = arith.constant 0 : index
    %c0_72 = arith.constant 0 : index
    %141 = vector.load %arg14[%c0_70, %c0_71, %c0_72] : memref<2x1x32xf32, #tpu.memory_space<vmem>>, vector<1x1x32xf32>
    %142 = vector.shape_cast %141 : vector<1x1x32xf32> to vector<1x32xf32>
    %c0_73 = arith.constant 0 : index
    %c0_74 = arith.constant 0 : index
    %c0_75 = arith.constant 0 : index
    %143 = vector.load %arg15[%c0_73, %c0_74, %c0_75] : memref<2x1x32xf32, #tpu.memory_space<vmem>>, vector<1x1x32xf32>
    %144 = vector.shape_cast %143 : vector<1x1x32xf32> to vector<1x32xf32>
    %cst_76 = arith.constant dense<0.000000e+00> : vector<16xf32>
    %145 = vector.multi_reduction <add>, %140, %cst_76 [1] : vector<16x32xf32> to vector<16xf32>
    %146 = vector.shape_cast %145 : vector<16xf32> to vector<16x1xf32>
    %cst_77 = arith.constant 3.200000e+01 : f32
    %147 = vector.broadcast %cst_77 : f32 to vector<16x1xf32>
    %148 = arith.divf %146, %147 : vector<16x1xf32>
    %149 = vector.broadcast %148 : vector<16x1xf32> to vector<16x32xf32>
    %150 = arith.subf %140, %149 : vector<16x32xf32>
    %151 = arith.mulf %150, %150 : vector<16x32xf32>
    %cst_78 = arith.constant dense<0.000000e+00> : vector<16xf32>
    %152 = vector.multi_reduction <add>, %151, %cst_78 [1] : vector<16x32xf32> to vector<16xf32>
    %153 = vector.shape_cast %152 : vector<16xf32> to vector<16x1xf32>
    %cst_79 = arith.constant 3.200000e+01 : f32
    %154 = vector.broadcast %cst_79 : f32 to vector<16x1xf32>
    %155 = arith.divf %153, %154 : vector<16x1xf32>
    %cst_80 = arith.constant 9.99999974E-6 : f32
    %156 = vector.broadcast %cst_80 : f32 to vector<16x1xf32>
    %157 = arith.addf %155, %156 : vector<16x1xf32>
    %158 = math.rsqrt %157 : vector<16x1xf32>
    %159 = vector.broadcast %148 : vector<16x1xf32> to vector<16x32xf32>
    %160 = arith.subf %140, %159 : vector<16x32xf32>
    %161 = vector.broadcast %158 : vector<16x1xf32> to vector<16x32xf32>
    %162 = arith.mulf %160, %161 : vector<16x32xf32>
    %163 = vector.broadcast %142 : vector<1x32xf32> to vector<16x32xf32>
    %164 = arith.mulf %162, %163 : vector<16x32xf32>
    %165 = vector.broadcast %144 : vector<1x32xf32> to vector<16x32xf32>
    %166 = arith.addf %164, %165 : vector<16x32xf32>
    %c1 = arith.constant 1 : index
    %c0_81 = arith.constant 0 : index
    %c0_82 = arith.constant 0 : index
    %167 = vector.load %arg4[%c1, %c0_81, %c0_82] : memref<2x32x96xf32, #tpu.memory_space<vmem>>, vector<1x32x96xf32>
    %168 = vector.shape_cast %167 : vector<1x32x96xf32> to vector<32x96xf32>
    %cst_83 = arith.constant dense<0.000000e+00> : vector<16x96xf32>
    %169 = tpu.matmul %166, %168, %cst_83 {dimension_numbers = #tpu.dot_dimension_numbers<[1], [0], [0], [1], [0, 0, 1, 1], [], []>} : vector<16x32xf32>, vector<32x96xf32>, vector<16x96xf32> -> vector<16x96xf32>
    %c1_84 = arith.constant 1 : index
    %c0_85 = arith.constant 0 : index
    %c0_86 = arith.constant 0 : index
    %170 = vector.load %arg5[%c1_84, %c0_85, %c0_86] : memref<2x1x96xf32, #tpu.memory_space<vmem>>, vector<1x1x96xf32>
    %171 = vector.shape_cast %170 : vector<1x1x96xf32> to vector<1x96xf32>
    %172 = vector.broadcast %171 : vector<1x96xf32> to vector<16x96xf32>
    %173 = arith.addf %169, %172 : vector<16x96xf32>
    %174 = vector.extract_strided_slice %173 {offsets = [0, 0], sizes = [16, 32], strides = [1, 1]} : vector<16x96xf32> to vector<16x32xf32>
    %175 = vector.extract_strided_slice %173 {offsets = [0, 32], sizes = [16, 32], strides = [1, 1]} : vector<16x96xf32> to vector<16x32xf32>
    %176 = vector.extract_strided_slice %173 {offsets = [0, 64], sizes = [16, 32], strides = [1, 1]} : vector<16x96xf32> to vector<16x32xf32>
    %177 = vector.extract_strided_slice %174 {offsets = [0, 0], sizes = [16, 8], strides = [1, 1]} : vector<16x32xf32> to vector<16x8xf32>
    %178 = vector.extract_strided_slice %175 {offsets = [0, 0], sizes = [16, 8], strides = [1, 1]} : vector<16x32xf32> to vector<16x8xf32>
    %179 = vector.extract_strided_slice %176 {offsets = [0, 0], sizes = [16, 8], strides = [1, 1]} : vector<16x32xf32> to vector<16x8xf32>
    %cst_87 = arith.constant dense<0.000000e+00> : vector<16x16xf32>
    %180 = tpu.matmul %177, %178, %cst_87 {dimension_numbers = #tpu.dot_dimension_numbers<[1], [1], [0], [0], [0, 0, 1, 0], [], []>} : vector<16x8xf32>, vector<16x8xf32>, vector<16x16xf32> -> vector<16x16xf32>
    %181 = arith.addf %180, %10 : vector<16x16xf32>
    %cst_88 = arith.constant dense<0xFF800000> : vector<16xf32>
    %182 = vector.multi_reduction <maximumf>, %181, %cst_88 [1] : vector<16x16xf32> to vector<16xf32>
    %183 = vector.shape_cast %182 : vector<16xf32> to vector<16x1xf32>
    %184 = vector.broadcast %183 : vector<16x1xf32> to vector<16x16xf32>
    %185 = arith.subf %181, %184 : vector<16x16xf32>
    %186 = math.exp %185 : vector<16x16xf32>
    %cst_89 = arith.constant dense<0.000000e+00> : vector<16xf32>
    %187 = vector.multi_reduction <add>, %186, %cst_89 [1] : vector<16x16xf32> to vector<16xf32>
    %188 = vector.shape_cast %187 : vector<16xf32> to vector<16x1xf32>
    %189 = tpu.reciprocal %188 {approx = true} : vector<16x1xf32> -> vector<16x1xf32>
    %190 = vector.broadcast %189 : vector<16x1xf32> to vector<16x16xf32>
    %191 = arith.mulf %186, %190 : vector<16x16xf32>
    %cst_90 = arith.constant dense<0.000000e+00> : vector<16x8xf32>
    %192 = tpu.matmul %191, %179, %cst_90 {dimension_numbers = #tpu.dot_dimension_numbers<[1], [0], [0], [1], [0, 0, 1, 1], [], []>} : vector<16x16xf32>, vector<16x8xf32>, vector<16x8xf32> -> vector<16x8xf32>
    %c0_91 = arith.constant 0 : index
    %c0_92 = arith.constant 0 : index
    %193 = vector.load %arg19[%c0_91, %c0_92] : memref<16x32xf32, #tpu.memory_space<vmem>>, vector<16x8xf32>
    tpu.vector_store %arg19[%c0_91, %c0_92], %192 {strides = array<i32>} : memref<16x32xf32, #tpu.memory_space<vmem>>, vector<16x8xf32>,
    %194 = vector.extract_strided_slice %174 {offsets = [0, 8], sizes = [16, 8], strides = [1, 1]} : vector<16x32xf32> to vector<16x8xf32>
    %195 = vector.extract_strided_slice %175 {offsets = [0, 8], sizes = [16, 8], strides = [1, 1]} : vector<16x32xf32> to vector<16x8xf32>
    %196 = vector.extract_strided_slice %176 {offsets = [0, 8], sizes = [16, 8], strides = [1, 1]} : vector<16x32xf32> to vector<16x8xf32>
    %cst_93 = arith.constant dense<0.000000e+00> : vector<16x16xf32>
    %197 = tpu.matmul %194, %195, %cst_93 {dimension_numbers = #tpu.dot_dimension_numbers<[1], [1], [0], [0], [0, 0, 1, 0], [], []>} : vector<16x8xf32>, vector<16x8xf32>, vector<16x16xf32> -> vector<16x16xf32>
    %198 = arith.addf %197, %10 : vector<16x16xf32>
    %cst_94 = arith.constant dense<0xFF800000> : vector<16xf32>
    %199 = vector.multi_reduction <maximumf>, %198, %cst_94 [1] : vector<16x16xf32> to vector<16xf32>
    %200 = vector.shape_cast %199 : vector<16xf32> to vector<16x1xf32>
    %201 = vector.broadcast %200 : vector<16x1xf32> to vector<16x16xf32>
    %202 = arith.subf %198, %201 : vector<16x16xf32>
    %203 = math.exp %202 : vector<16x16xf32>
    %cst_95 = arith.constant dense<0.000000e+00> : vector<16xf32>
    %204 = vector.multi_reduction <add>, %203, %cst_95 [1] : vector<16x16xf32> to vector<16xf32>
    %205 = vector.shape_cast %204 : vector<16xf32> to vector<16x1xf32>
    %206 = tpu.reciprocal %205 {approx = true} : vector<16x1xf32> -> vector<16x1xf32>
    %207 = vector.broadcast %206 : vector<16x1xf32> to vector<16x16xf32>
    %208 = arith.mulf %203, %207 : vector<16x16xf32>
    %cst_96 = arith.constant dense<0.000000e+00> : vector<16x8xf32>
    %209 = tpu.matmul %208, %196, %cst_96 {dimension_numbers = #tpu.dot_dimension_numbers<[1], [0], [0], [1], [0, 0, 1, 1], [], []>} : vector<16x16xf32>, vector<16x8xf32>, vector<16x8xf32> -> vector<16x8xf32>
    %c0_97 = arith.constant 0 : index
    %c8_98 = arith.constant 8 : index
    %210 = vector.load %arg19[%c0_97, %c8_98] : memref<16x32xf32, #tpu.memory_space<vmem>>, vector<16x8xf32>
    tpu.vector_store %arg19[%c0_97, %c8_98], %209 {strides = array<i32>} : memref<16x32xf32, #tpu.memory_space<vmem>>, vector<16x8xf32>,
    %211 = vector.extract_strided_slice %174 {offsets = [0, 16], sizes = [16, 8], strides = [1, 1]} : vector<16x32xf32> to vector<16x8xf32>
    %212 = vector.extract_strided_slice %175 {offsets = [0, 16], sizes = [16, 8], strides = [1, 1]} : vector<16x32xf32> to vector<16x8xf32>
    %213 = vector.extract_strided_slice %176 {offsets = [0, 16], sizes = [16, 8], strides = [1, 1]} : vector<16x32xf32> to vector<16x8xf32>
    %cst_99 = arith.constant dense<0.000000e+00> : vector<16x16xf32>
    %214 = tpu.matmul %211, %212, %cst_99 {dimension_numbers = #tpu.dot_dimension_numbers<[1], [1], [0], [0], [0, 0, 1, 0], [], []>} : vector<16x8xf32>, vector<16x8xf32>, vector<16x16xf32> -> vector<16x16xf32>
    %215 = arith.addf %214, %10 : vector<16x16xf32>
    %cst_100 = arith.constant dense<0xFF800000> : vector<16xf32>
    %216 = vector.multi_reduction <maximumf>, %215, %cst_100 [1] : vector<16x16xf32> to vector<16xf32>
    %217 = vector.shape_cast %216 : vector<16xf32> to vector<16x1xf32>
    %218 = vector.broadcast %217 : vector<16x1xf32> to vector<16x16xf32>
    %219 = arith.subf %215, %218 : vector<16x16xf32>
    %220 = math.exp %219 : vector<16x16xf32>
    %cst_101 = arith.constant dense<0.000000e+00> : vector<16xf32>
    %221 = vector.multi_reduction <add>, %220, %cst_101 [1] : vector<16x16xf32> to vector<16xf32>
    %222 = vector.shape_cast %221 : vector<16xf32> to vector<16x1xf32>
    %223 = tpu.reciprocal %222 {approx = true} : vector<16x1xf32> -> vector<16x1xf32>
    %224 = vector.broadcast %223 : vector<16x1xf32> to vector<16x16xf32>
    %225 = arith.mulf %220, %224 : vector<16x16xf32>
    %cst_102 = arith.constant dense<0.000000e+00> : vector<16x8xf32>
    %226 = tpu.matmul %225, %213, %cst_102 {dimension_numbers = #tpu.dot_dimension_numbers<[1], [0], [0], [1], [0, 0, 1, 1], [], []>} : vector<16x16xf32>, vector<16x8xf32>, vector<16x8xf32> -> vector<16x8xf32>
    %c0_103 = arith.constant 0 : index
    %c16_104 = arith.constant 16 : index
    %227 = vector.load %arg19[%c0_103, %c16_104] : memref<16x32xf32, #tpu.memory_space<vmem>>, vector<16x8xf32>
    tpu.vector_store %arg19[%c0_103, %c16_104], %226 {strides = array<i32>} : memref<16x32xf32, #tpu.memory_space<vmem>>, vector<16x8xf32>,
    %228 = vector.extract_strided_slice %174 {offsets = [0, 24], sizes = [16, 8], strides = [1, 1]} : vector<16x32xf32> to vector<16x8xf32>
    %229 = vector.extract_strided_slice %175 {offsets = [0, 24], sizes = [16, 8], strides = [1, 1]} : vector<16x32xf32> to vector<16x8xf32>
    %230 = vector.extract_strided_slice %176 {offsets = [0, 24], sizes = [16, 8], strides = [1, 1]} : vector<16x32xf32> to vector<16x8xf32>
    %cst_105 = arith.constant dense<0.000000e+00> : vector<16x16xf32>
    %231 = tpu.matmul %228, %229, %cst_105 {dimension_numbers = #tpu.dot_dimension_numbers<[1], [1], [0], [0], [0, 0, 1, 0], [], []>} : vector<16x8xf32>, vector<16x8xf32>, vector<16x16xf32> -> vector<16x16xf32>
    %232 = arith.addf %231, %10 : vector<16x16xf32>
    %cst_106 = arith.constant dense<0xFF800000> : vector<16xf32>
    %233 = vector.multi_reduction <maximumf>, %232, %cst_106 [1] : vector<16x16xf32> to vector<16xf32>
    %234 = vector.shape_cast %233 : vector<16xf32> to vector<16x1xf32>
    %235 = vector.broadcast %234 : vector<16x1xf32> to vector<16x16xf32>
    %236 = arith.subf %232, %235 : vector<16x16xf32>
    %237 = math.exp %236 : vector<16x16xf32>
    %cst_107 = arith.constant dense<0.000000e+00> : vector<16xf32>
    %238 = vector.multi_reduction <add>, %237, %cst_107 [1] : vector<16x16xf32> to vector<16xf32>
    %239 = vector.shape_cast %238 : vector<16xf32> to vector<16x1xf32>
    %240 = tpu.reciprocal %239 {approx = true} : vector<16x1xf32> -> vector<16x1xf32>
    %241 = vector.broadcast %240 : vector<16x1xf32> to vector<16x16xf32>
    %242 = arith.mulf %237, %241 : vector<16x16xf32>
    %cst_108 = arith.constant dense<0.000000e+00> : vector<16x8xf32>
    %243 = tpu.matmul %242, %230, %cst_108 {dimension_numbers = #tpu.dot_dimension_numbers<[1], [0], [0], [1], [0, 0, 1, 1], [], []>} : vector<16x16xf32>, vector<16x8xf32>, vector<16x8xf32> -> vector<16x8xf32>
    %c0_109 = arith.constant 0 : index
    %c24_110 = arith.constant 24 : index
    %244 = vector.load %arg19[%c0_109, %c24_110] : memref<16x32xf32, #tpu.memory_space<vmem>>, vector<16x8xf32>
    tpu.vector_store %arg19[%c0_109, %c24_110], %243 {strides = array<i32>} : memref<16x32xf32, #tpu.memory_space<vmem>>, vector<16x8xf32>,
    %c0_111 = arith.constant 0 : index
    %c0_112 = arith.constant 0 : index
    %245 = vector.load %arg19[%c0_111, %c0_112] : memref<16x32xf32, #tpu.memory_space<vmem>>, vector<16x32xf32>
    %c1_113 = arith.constant 1 : index
    %c0_114 = arith.constant 0 : index
    %c0_115 = arith.constant 0 : index
    %246 = vector.load %arg6[%c1_113, %c0_114, %c0_115] : memref<2x32x32xf32, #tpu.memory_space<vmem>>, vector<1x32x32xf32>
    %247 = vector.shape_cast %246 : vector<1x32x32xf32> to vector<32x32xf32>
    %cst_116 = arith.constant dense<0.000000e+00> : vector<16x32xf32>
    %248 = tpu.matmul %245, %247, %cst_116 {dimension_numbers = #tpu.dot_dimension_numbers<[1], [0], [0], [1], [0, 0, 1, 1], [], []>} : vector<16x32xf32>, vector<32x32xf32>, vector<16x32xf32> -> vector<16x32xf32>
    %c1_117 = arith.constant 1 : index
    %c0_118 = arith.constant 0 : index
    %c0_119 = arith.constant 0 : index
    %249 = vector.load %arg7[%c1_117, %c0_118, %c0_119] : memref<2x1x32xf32, #tpu.memory_space<vmem>>, vector<1x1x32xf32>
    %250 = vector.shape_cast %249 : vector<1x1x32xf32> to vector<1x32xf32>
    %251 = vector.broadcast %250 : vector<1x32xf32> to vector<16x32xf32>
    %252 = arith.addf %248, %251 : vector<16x32xf32>
    %253 = arith.addf %166, %252 : vector<16x32xf32>
    %c1_120 = arith.constant 1 : index
    %c0_121 = arith.constant 0 : index
    %c0_122 = arith.constant 0 : index
    %254 = vector.load %arg12[%c1_120, %c0_121, %c0_122] : memref<2x1x32xf32, #tpu.memory_space<vmem>>, vector<1x1x32xf32>
    %255 = vector.shape_cast %254 : vector<1x1x32xf32> to vector<1x32xf32>
    %c1_123 = arith.constant 1 : index
    %c0_124 = arith.constant 0 : index
    %c0_125 = arith.constant 0 : index
    %256 = vector.load %arg13[%c1_123, %c0_124, %c0_125] : memref<2x1x32xf32, #tpu.memory_space<vmem>>, vector<1x1x32xf32>
    %257 = vector.shape_cast %256 : vector<1x1x32xf32> to vector<1x32xf32>
    %cst_126 = arith.constant dense<0.000000e+00> : vector<16xf32>
    %258 = vector.multi_reduction <add>, %253, %cst_126 [1] : vector<16x32xf32> to vector<16xf32>
    %259 = vector.shape_cast %258 : vector<16xf32> to vector<16x1xf32>
    %cst_127 = arith.constant 3.200000e+01 : f32
    %260 = vector.broadcast %cst_127 : f32 to vector<16x1xf32>
    %261 = arith.divf %259, %260 : vector<16x1xf32>
    %262 = vector.broadcast %261 : vector<16x1xf32> to vector<16x32xf32>
    %263 = arith.subf %253, %262 : vector<16x32xf32>
    %264 = arith.mulf %263, %263 : vector<16x32xf32>
    %cst_128 = arith.constant dense<0.000000e+00> : vector<16xf32>
    %265 = vector.multi_reduction <add>, %264, %cst_128 [1] : vector<16x32xf32> to vector<16xf32>
    %266 = vector.shape_cast %265 : vector<16xf32> to vector<16x1xf32>
    %cst_129 = arith.constant 3.200000e+01 : f32
    %267 = vector.broadcast %cst_129 : f32 to vector<16x1xf32>
    %268 = arith.divf %266, %267 : vector<16x1xf32>
    %cst_130 = arith.constant 9.99999974E-6 : f32
    %269 = vector.broadcast %cst_130 : f32 to vector<16x1xf32>
    %270 = arith.addf %268, %269 : vector<16x1xf32>
    %271 = math.rsqrt %270 : vector<16x1xf32>
    %272 = vector.broadcast %261 : vector<16x1xf32> to vector<16x32xf32>
    %273 = arith.subf %253, %272 : vector<16x32xf32>
    %274 = vector.broadcast %271 : vector<16x1xf32> to vector<16x32xf32>
    %275 = arith.mulf %273, %274 : vector<16x32xf32>
    %276 = vector.broadcast %255 : vector<1x32xf32> to vector<16x32xf32>
    %277 = arith.mulf %275, %276 : vector<16x32xf32>
    %278 = vector.broadcast %257 : vector<1x32xf32> to vector<16x32xf32>
    %279 = arith.addf %277, %278 : vector<16x32xf32>
    %c1_131 = arith.constant 1 : index
    %c0_132 = arith.constant 0 : index
    %c0_133 = arith.constant 0 : index
    %280 = vector.load %arg8[%c1_131, %c0_132, %c0_133] : memref<2x32x64xf32, #tpu.memory_space<vmem>>, vector<1x32x64xf32>
    %281 = vector.shape_cast %280 : vector<1x32x64xf32> to vector<32x64xf32>
    %cst_134 = arith.constant dense<0.000000e+00> : vector<16x64xf32>
    %282 = tpu.matmul %279, %281, %cst_134 {dimension_numbers = #tpu.dot_dimension_numbers<[1], [0], [0], [1], [0, 0, 1, 1], [], []>} : vector<16x32xf32>, vector<32x64xf32>, vector<16x64xf32> -> vector<16x64xf32>
    %c1_135 = arith.constant 1 : index
    %c0_136 = arith.constant 0 : index
    %c0_137 = arith.constant 0 : index
    %283 = vector.load %arg9[%c1_135, %c0_136, %c0_137] : memref<2x1x64xf32, #tpu.memory_space<vmem>>, vector<1x1x64xf32>
    %284 = vector.shape_cast %283 : vector<1x1x64xf32> to vector<1x64xf32>
    %285 = vector.broadcast %284 : vector<1x64xf32> to vector<16x64xf32>
    %286 = arith.addf %282, %285 : vector<16x64xf32>
    %cst_138 = arith.constant 0.000000e+00 : f32
    %287 = vector.broadcast %cst_138 : f32 to vector<16x64xf32>
    %288 = arith.maximumf %286, %287 : vector<16x64xf32>
    %c1_139 = arith.constant 1 : index
    %c0_140 = arith.constant 0 : index
    %c0_141 = arith.constant 0 : index
    %289 = vector.load %arg10[%c1_139, %c0_140, %c0_141] : memref<2x64x32xf32, #tpu.memory_space<vmem>>, vector<1x64x32xf32>
    %290 = vector.shape_cast %289 : vector<1x64x32xf32> to vector<64x32xf32>
    %cst_142 = arith.constant dense<0.000000e+00> : vector<16x32xf32>
    %291 = tpu.matmul %288, %290, %cst_142 {dimension_numbers = #tpu.dot_dimension_numbers<[1], [0], [0], [1], [0, 0, 1, 1], [], []>} : vector<16x64xf32>, vector<64x32xf32>, vector<16x32xf32> -> vector<16x32xf32>
    %c1_143 = arith.constant 1 : index
    %c0_144 = arith.constant 0 : index
    %c0_145 = arith.constant 0 : index
    %292 = vector.load %arg11[%c1_143, %c0_144, %c0_145] : memref<2x1x32xf32, #tpu.memory_space<vmem>>, vector<1x1x32xf32>
    %293 = vector.shape_cast %292 : vector<1x1x32xf32> to vector<1x32xf32>
    %294 = vector.broadcast %293 : vector<1x32xf32> to vector<16x32xf32>
    %295 = arith.addf %291, %294 : vector<16x32xf32>
    %296 = arith.addf %279, %295 : vector<16x32xf32>
    %c1_146 = arith.constant 1 : index
    %c0_147 = arith.constant 0 : index
    %c0_148 = arith.constant 0 : index
    %297 = vector.load %arg14[%c1_146, %c0_147, %c0_148] : memref<2x1x32xf32, #tpu.memory_space<vmem>>, vector<1x1x32xf32>
    %298 = vector.shape_cast %297 : vector<1x1x32xf32> to vector<1x32xf32>
    %c1_149 = arith.constant 1 : index
    %c0_150 = arith.constant 0 : index
    %c0_151 = arith.constant 0 : index
    %299 = vector.load %arg15[%c1_149, %c0_150, %c0_151] : memref<2x1x32xf32, #tpu.memory_space<vmem>>, vector<1x1x32xf32>
    %300 = vector.shape_cast %299 : vector<1x1x32xf32> to vector<1x32xf32>
    %cst_152 = arith.constant dense<0.000000e+00> : vector<16xf32>
    %301 = vector.multi_reduction <add>, %296, %cst_152 [1] : vector<16x32xf32> to vector<16xf32>
    %302 = vector.shape_cast %301 : vector<16xf32> to vector<16x1xf32>
    %cst_153 = arith.constant 3.200000e+01 : f32
    %303 = vector.broadcast %cst_153 : f32 to vector<16x1xf32>
    %304 = arith.divf %302, %303 : vector<16x1xf32>
    %305 = vector.broadcast %304 : vector<16x1xf32> to vector<16x32xf32>
    %306 = arith.subf %296, %305 : vector<16x32xf32>
    %307 = arith.mulf %306, %306 : vector<16x32xf32>
    %cst_154 = arith.constant dense<0.000000e+00> : vector<16xf32>
    %308 = vector.multi_reduction <add>, %307, %cst_154 [1] : vector<16x32xf32> to vector<16xf32>
    %309 = vector.shape_cast %308 : vector<16xf32> to vector<16x1xf32>
    %cst_155 = arith.constant 3.200000e+01 : f32
    %310 = vector.broadcast %cst_155 : f32 to vector<16x1xf32>
    %311 = arith.divf %309, %310 : vector<16x1xf32>
    %cst_156 = arith.constant 9.99999974E-6 : f32
    %312 = vector.broadcast %cst_156 : f32 to vector<16x1xf32>
    %313 = arith.addf %311, %312 : vector<16x1xf32>
    %314 = math.rsqrt %313 : vector<16x1xf32>
    %315 = vector.broadcast %304 : vector<16x1xf32> to vector<16x32xf32>
    %316 = arith.subf %296, %315 : vector<16x32xf32>
    %317 = vector.broadcast %314 : vector<16x1xf32> to vector<16x32xf32>
    %318 = arith.mulf %316, %317 : vector<16x32xf32>
    %319 = vector.broadcast %298 : vector<1x32xf32> to vector<16x32xf32>
    %320 = arith.mulf %318, %319 : vector<16x32xf32>
    %321 = vector.broadcast %300 : vector<1x32xf32> to vector<16x32xf32>
    %322 = arith.addf %320, %321 : vector<16x32xf32>
    %c0_157 = arith.constant 0 : index
    %c0_158 = arith.constant 0 : index
    %323 = vector.load %arg16[%c0_157, %c0_158] : memref<32x128xf32, #tpu.memory_space<vmem>>, vector<32x128xf32>
    %cst_159 = arith.constant dense<0.000000e+00> : vector<16x128xf32>
    %324 = tpu.matmul %322, %323, %cst_159 {dimension_numbers = #tpu.dot_dimension_numbers<[1], [0], [0], [1], [0, 0, 1, 1], [], []>} : vector<16x32xf32>, vector<32x128xf32>, vector<16x128xf32> -> vector<16x128xf32>
    %c0_160 = arith.constant 0 : index
    %c0_161 = arith.constant 0 : index
    %325 = vector.load %arg17[%c0_160, %c0_161] : memref<1x128xf32, #tpu.memory_space<vmem>>, vector<1x128xf32>
    %326 = vector.broadcast %325 : vector<1x128xf32> to vector<16x128xf32>
    %327 = arith.addf %324, %326 : vector<16x128xf32>
    %c0_162 = arith.constant 0 : index
    %c0_163 = arith.constant 0 : index
    %328 = vector.load %arg18[%c0_162, %c0_163] : memref<16x128xf32, #tpu.memory_space<vmem>>, vector<16x128xf32>
    tpu.vector_store %arg18[%c0_162, %c0_163], %327 {strides = array<i32>} : memref<16x128xf32, #tpu.memory_space<vmem>>, vector<16x128xf32>,
    return
  }
}

</mosaic_0001>

<bundles_post_ra>
// kernel: toy_transformer_forward.1
= control target key start
LH: loop header
LB: loop body
LE: loop exit
PB: predicated region body
PF: predicated region fallthrough
CT: control target
= control target key end

     0   :  { %s4417_s0 = inlined_call_operand.vmem [shape: s32[16,1], index: 0, kind: input, shape index: {}]   ;;  %s4418_s1 = inlined_call_operand.vmem [shape: f32[16,16], index: 1, kind: input, shape index: {}]   ;;  %s4419_s2 = inlined_call_operand.vmem [shape: f32[50,32], index: 2, kind: input, shape index: {}]   ;;  %s4420_s3 = inlined_call_operand.vmem [shape: f32[16,32], index: 3, kind: input, shape index: {}]   ;;  %s4421_s4 = inlined_call_operand.vmem [shape: f32[2,32,96], index: 4, kind: input, shape index: {}]   ;;  %s4422_s5 = inlined_call_operand.vmem [shape: f32[2,1,96], index: 5, kind: input, shape index: {}]   ;;  %s4423_s6 = inlined_call_operand.vmem [shape: f32[2,32,32], index: 6, kind: input, shape index: {}]   ;;  %s4424_s7 = inlined_call_operand.vmem [shape: f32[2,1,32], index: 7, kind: input, shape index: {}]   ;;  %s4425_s8 = inlined_call_operand.vmem [shape: f32[2,32,64], index: 8, kind: input, shape index: {}]   ;;  %s4426_s9 = inlined_call_operand.vmem [shape: f32[2,1,64], index: 9, kind: input, shape index: {}]   ;;  %s4427_s10 = inlined_call_operand.vmem [shape: f32[2,64,32], index: 10, kind: input, shape index: {}]   ;;  %s4428_s11 = inlined_call_operand.vmem [shape: f32[2,1,32], index: 11, kind: input, shape index: {}]   ;;  %s4429_s12 = inlined_call_operand.vmem [shape: f32[2,1,32], index: 12, kind: input, shape index: {}]   ;;  %s4430_s13 = inlined_call_operand.vmem [shape: f32[2,1,32], index: 13, kind: input, shape index: {}]   ;;  %s4431_s14 = inlined_call_operand.vmem [shape: f32[2,1,32], index: 14, kind: input, shape index: {}]   ;;  %s4432_s15 = inlined_call_operand.vmem [shape: f32[2,1,32], index: 15, kind: input, shape index: {}]   ;;  %s4433_s16 = inlined_call_operand.vmem [shape: f32[32,128], index: 16, kind: input, shape index: {}]   ;;  %s4434_s17 = inlined_call_operand.vmem [shape: f32[1,128], index: 17, kind: input, shape index: {}]   ;;  %s4435_s18 = inlined_call_operand.hbm [shape: f32[16,128], index: 18, kind: output, shape index: {}]  }
   0x1   :  { %4453 = sst [smem:[#allocation6_spill]] %s4417_s0 }
   0x2   :  { %4454 = sst [smem:[#allocation7_spill]] %s4418_s1 }
   0x3   :  { %4455 = sst [smem:[#allocation8_spill]] %s4419_s2 }
   0x4   :  { %4456 = sst [smem:[#allocation9_spill]] %s4428_s11 }
   0x5   :  { %s4457_s29 = sld [smem:[#allocation6_spill]]  ;;  %s4458_s11 = sld [smem:[#allocation8_spill]]  ;;  %v3779_v2 = vmov 0  }
   0x6   :  { %3592 = vset.pattern.permute.xlu0 %v3779_v2 }
   0xb   :  { %v60_v0 = vld [vmem:[%s4457_s29] sm:$0xff]  ;;  %v77_v3 = vld [vmem:[%s4458_s11 + $0x8] sm:$0xff]  ;;  %v78_v4 = vld [vmem:[%s4458_s11 + $0x10] sm:$0xff] }
   0xc   :  { %v76_v1 = vld [vmem:[%s4458_s11] sm:$0xff]  ;;  %v79_v5 = vld [vmem:[%s4458_s11 + $0x18] sm:$0xff]  ;;  %65 = vperm.xlu0 %3592, %v60_v0  }
   0xd   :  { %v3394_v6 = vpack.c.bf16 %v77_v3, %v76_v1  ;;  %v3398_v7 = vpack.c.bf16 %v79_v5, %v78_v4 }
   0xe   :  { %23 = vsyncpa [#allocation4], 0  ;;  %v61_v8 = vld [vmem:[%s4457_s29 + $0x8] sm:$0xff]  ;;  %v80_v9 = vld [vmem:[%s4458_s11 + $0x20] sm:$0xff]  ;;  %vm92_vm0 = vcmask 1041408   ;;  %v62_v16 = vlaneseq  ;;  %vm85_vm1 = vcmask 408576  }
   0xf   :  { %v81_v10 = vld [vmem:[%s4458_s11 + $0x28] sm:$0xff]  ;;  %3395 = vmatprep.subr.bf16.mxu0 %v3394_v6  ;;  %v173_v12 = vld [vmem:[%s4421_s4] sm:$0xff]  ;;  %v82_v15 = vld [vmem:[%s4458_s11 + $0x30] sm:$0x3]  ;;  %v3780_v19 = vmov 0.0   ;;  %vm184_vm4 = vcmask 261120  }
  0x10   :  { %3397 = vmatpush3.bf16.msra.mxu0 %v3394_v6  ;;  %68 = vperm.xlu0 %3592, %v61_v8   ;;  %v3402_v11 = vpack.c.bf16 %v81_v10, %v80_v9  ;;  %v174_v13 = vld [vmem:[%s4421_s4 + $0x8] sm:$0xff]  ;;  %v63_v17 = vand.u32 127, %v62_v16  ;;  %v175_v23 = vld [vmem:[%s4421_s4 + $0x10] sm:$0xff]  ;;  %v176_v24 = vld [vmem:[%s4421_s4 + $0x18] sm:$0xff]  ;;  %vm272_vm5 = vcmask 64512   ;;  %s4461_s19 = sld [smem:[#allocation7_spill]] }
  0x11   :  { %3399 = vmatprep.subr.bf16.mxu0 %v3398_v7  ;;  %v3406_v14 = vpack.c.bf16 %v174_v13, %v173_v12  ;;  %v3410_v25 = vpack.c.bf16 %v176_v24, %v175_v23  ;;  %v83_v26 = vld [vmem:[%s4420_s3] sm:$0xff]  ;;  %v84_v27 = vld [vmem:[%s4420_s3 + $0x8] sm:$0xff]  ;;  %s3781_s3 = smov 96   ;;  %vm3962_vm6 = vmpackc.low %vm272_vm5, %vm272_vm5  ;;  %vm356_vm7 = vcmask 130048   ;;  %s3782_s20 = smov 88   ;;  %vm676_vm8 = vcmask 130112  }
  0x12   :  { %v2904_v32 = vld [vmem:[%s4422_s5] ss:$0 sm:$0xff]  ;;  %s3783_s21 = smov 120   ;;  %s3784_s11 = smov 64   ;;  %vm887_vm9 = vcmask 195712   ;;  %vm1098_vm10 = vcmask 261312  }
  0x13   :  { %3407 = vmatprep.subr.bf16.mxu1 %v3406_v14  ;;  %s3785_s22 = smov 80   ;;  %s4451_s2 = smov 112   ;;  %vm1351_vm11 = vcmask 523264  }
  0x14   :  { %3401 = vmatpush3.bf16.msra.mxu0 %v3398_v7  ;;  %3409 = vmatpush3.bf16.msra.mxu1 %v3406_v14  ;;  %s3787_s23 = smov 56   ;;  %s4450_s24 = smov 72  }
  0x15   :  { %3403 = vmatprep.subr.bf16.mxu0 %v3402_v11  ;;  %3411 = vmatprep.subr.bf16.mxu1 %v3410_v25  ;;  %s4446_s25 = smov 104   ;;  %s4445_s26 = smov 48  }
  0x16   :  { %v3975_v43 = vld [vmem:[%s4461_s19 + $0x8] sm:$0xff]  ;;  %v3980_v44 = vld [vmem:[%s4461_s19] sm:$0xff]  ;;  %s4443_s27 = smov 8   ;;  %s4442_s28 = smov 40  }
  0x17   :  { %s4440_s30 = smov 16   ;;  %s4448_s0 = smov 24  }
  0x18   :  { %3405 = vmatpush3.bf16.msra.mxu0 %v3402_v11  ;;  %3413 = vmatpush3.bf16.msra.mxu1 %v3410_v25 }
  0x19   :  { %3162 = vmatprep.subr.msk.mxu0 %vm92_vm0, %v82_v15 }
  0x1c   :  { %3163 = vmatpush3.msk.msra.mxu0 %vm92_vm0, %v82_v15 }
  0x8b   :  { %v66_v18 = vpop.permute.xlu0 %65 }
  0x8c   :  { %vm70_vm2 = vcmp.eq.s32.totalorder %v63_v17, %v66_v18 }
  0x8d   :  { %v2899_v20 = vsel %vm70_vm2, 1.0, %v3780_v19 }
  0x8e   :  { %3164 = vmatprep.mubr.msk.f32.mxu0 %vm85_vm1, %v2899_v20 }
  0x8f   :  { %v69_v21 = vpop.permute.xlu0 %68 }
  0x90   :  { %vm71_vm3 = vcmp.eq.s32.totalorder %v63_v17, %v69_v21 }
  0x91   :  { %v2900_v22 = vsel %vm71_vm3, 1.0, %v3780_v19 }
  0x92   :  { %3165 = vmatmul.mubr.msk.f32.vlgmr.msra.gmra.mrb[0].mxu0 %vm85_vm1, %v2900_v22 }
 0x165   :  { %v3166_v28 = vpop.f32.mrb[0].mxu0 }
 0x166   :  { %v162_v29 = vpop.f32.mrb[1].mxu0  ;;  %v3939_v31 = vadd.f32 %v3166_v28, %v84_v27 }
 0x167   :  { %v3937_v30 = vadd.f32 %v162_v29, %v83_v26 }
 0x169   :  { %3175 = vmatprep.mubr.msk.f32.mxu1 %vm184_vm4, %v3937_v30 }
 0x16a   :  { %3176 = vmatmul.mubr.msk.f32.vlgmr.msra.gmra.mrb[0].mxu1 %vm184_vm4, %v3939_v31 }
 0x23d   :  { %v3177_v33 = vpop.f32.mrb[0].mxu1 }
 0x23e   :  { %v3948_v34 = vadd.f32 %v3177_v33, %v2904_v32  ;;  %v257_v35 = vpop.f32.mrb[1].mxu1 }
 0x23f   :  { %v3950_v36 = vadd.f32 %v2904_v32, %v257_v35 }
 0x241   :  { %3182 = vmatprep.mubr.msk.f32.mxu1 %vm272_vm5, %v3950_v36  ;;  %v3956_v37 = vpack.i.bf16 %v3948_v34, %v3950_v36 }
 0x243   :  { %3594 = vrot.lane.b32.xlu1 %v3956_v37, %s3781_s3 }
 0x2b5   :  { %v3595_v38 = vpop.permute.xlu1 %3594 }
 0x2b6   :  { %v3597_v39 = vunpack.i.h.bf16 %v3595_v38  ;;  %v3596_v40 = vunpack.i.l.bf16 %v3595_v38 }
 0x2b8   :  { %v3414_v42 = vpack.c.bf16 %v3597_v39, %v3596_v40 }
 0x2ba   :  { %3416 = vmatprep.subr.msk.bf16.mxu1 %vm3962_vm6, %v3414_v42 }
 0x2bb   :  { %3419 = vmatpush3.bf16.xpose.msk.msra.mxu1 %vm3962_vm6, %v3414_v42 }
 0x2c2   :  { %3183 = vmatmul.mubr.msk.f32.vlgmr.msra.gmra.mrb[2].mxu1 %vm272_vm5, %v3948_v34 }
 0x395   :  { %v3184_v45 = vpop.f32.mrb[2].mxu1 }
 0x396   :  { %v353_v46 = vadd.f32 %v3184_v45, %v3975_v43  ;;  %v347_v47 = vpop.f32.mrb[3].mxu1 }
 0x397   :  { %v348_v48 = vadd.f32 %v347_v47, %v3980_v44 }
 0x398   :  { %v360_v49 = vsel %vm356_vm7, %v353_v46, -inf }
 0x399   :  { %361 = vmax.xlane.f32.xlu0 %v360_v49  ;;  %v357_v50 = vsel %vm356_vm7, %v348_v48, -inf }
 0x39a   :  { %358 = vmax.xlane.f32.xlu1 %v357_v50 }
 0x426   :  { %v362_v51 = vpop.xlane.xlu0 %361 }
 0x427   :  { %v364_v52 = vsub.f32 %v353_v46, %v362_v51  ;;  %v359_v53 = vpop.xlane.xlu1 %358 }
 0x428   :  { %v363_v54 = vsub.f32 %v348_v48, %v359_v53 }
 0x429   :  { %v367_v55 = vmul.f32 1.442695, %v364_v52 }
 0x42a   :  { %v365_v56 = vmul.f32 1.442695, %v363_v54 }
 0x42b   :  { %3673 = vpow2.f32 %v367_v55 }
 0x42c   :  { %3675 = vpow2.f32 %v365_v56 }
 0x435   :  { %v3674_v57 = vpop.eup %3673 }
 0x436   :  { %v3676_v58 = vpop.eup %3675  ;;  %v372_v59 = vsel %vm356_vm7, %v3674_v57, 0.0 }
 0x437   :  { %373 = vadd.xlane.f32.xlu1 %v372_v59  ;;  %v369_v60 = vsel %vm356_vm7, %v3676_v58, 0.0 }
 0x438   :  { %370 = vadd.xlane.f32.xlu0 %v369_v60 }
 0x448   :  { %3604 = vrot.lane.b32.xlu1 %v3956_v37, %s3782_s20 }
 0x44c   :  { %468 = vrot.lane.b32.xlu1 %v3950_v36, %s3783_s21 }
 0x44e   :  { %3599 = vrot.lane.b32.xlu0 %v3956_v37, %s3784_s11 }
 0x452   :  { %470 = vrot.lane.b32.xlu0 %v3948_v34, %s3783_s21 }
 0x4c4   :  { %v374_v61 = vpop.xlane.xlu1 %373 }
 0x4c5   :  { %3677 = vrcp.f32 %v374_v61  ;;  %v371_v62 = vpop.xlane.xlu0 %370 }
 0x4c6   :  { %3679 = vrcp.f32 %v371_v62 }
 0x4c8   :  { %v3605_v63 = vpop.permute.xlu1 %3604 }
 0x4c9   :  { %v3600_v0 = vpop.permute.xlu0 %3599  ;;  %v3607_v1 = vunpack.i.h.bf16 %v3605_v63  ;;  %v3606_v2 = vunpack.i.l.bf16 %v3605_v63 }
 0x4ca   :  { %v3602_v3 = vunpack.i.h.bf16 %v3600_v0  ;;  %v3601_v4 = vunpack.i.l.bf16 %v3600_v0 }
 0x4cb   :  { %v3424_v6 = vpack.c.bf16 %v3607_v1, %v3606_v2 }
 0x4cc   :  { %v3420_v5 = vpack.c.bf16 %v3602_v3, %v3601_v4  ;;  %v469_v11 = vpop.permute.xlu1 %468 }
 0x4cd   :  { %v471_v12 = vpop.permute.xlu0 %470 }
 0x4ce   :  { %3421 = vmatprep.subr.bf16.mxu1 %v3420_v5 }
 0x4cf   :  { %v3678_v7 = vpop.eup %3677  ;;  %3423 = vmatpush3.bf16.msra.mxu1 %v3420_v5 }
 0x4d0   :  { %v3680_v8 = vpop.eup %3679  ;;  %3426 = vmatprep.subr.msk.bf16.mxu1 %vm3962_vm6, %v3424_v6  ;;  %v378_v10 = vmul.f32 %v3678_v7, %v3674_v57 }
 0x4d1   :  { %v377_v9 = vmul.f32 %v3680_v8, %v3676_v58 }
 0x4d3   :  { %3189 = vmatprep.mubr.msk.f32.mxu1 %vm356_vm7, %v377_v9 }
 0x4d4   :  { %3190 = vmatmul.mubr.msk.f32.vlgmr.msra.gmra.mrb[4].mxu1 %vm356_vm7, %v378_v10 }
 0x4d5   :  { %3196 = vmatprep.mubr.msk.f32.mxu1 %vm272_vm5, %v469_v11 }
 0x4d8   :  { %3429 = vmatpush3.bf16.xpose.msk.msra.mxu1 %vm3962_vm6, %v3424_v6 }
 0x4df   :  { %3197 = vmatmul.mubr.msk.f32.vlgmr.msra.gmra.mrb[6].mxu1 %vm272_vm5, %v471_v12 }
 0x5a7   :  { %v3191_v13 = vpop.f32.mrb[4].mxu1 }
 0x5a8   :  { %467 = vst.msk [vmem:[#allocation2 + $0x8] sm:$0xff] %vm272_vm5, %v3191_v13  ;;  %v457_v14 = vpop.f32.mrb[5].mxu1 }
 0x5a9   :  { %466 = vst.msk [vmem:[#allocation2] sm:$0xff] %vm272_vm5, %v457_v14 }
 0x5b2   :  { %v3198_v15 = vpop.f32.mrb[6].mxu1 }
 0x5b3   :  { %v556_v16 = vadd.f32 %v3198_v15, %v3975_v43  ;;  %v550_v17 = vpop.f32.mrb[7].mxu1 }
 0x5b4   :  { %v551_v18 = vadd.f32 %v550_v17, %v3980_v44 }
 0x5b5   :  { %v562_v19 = vsel %vm356_vm7, %v556_v16, -inf }
 0x5b6   :  { %563 = vmax.xlane.f32.xlu0 %v562_v19  ;;  %v559_v20 = vsel %vm356_vm7, %v551_v18, -inf }
 0x5b7   :  { %560 = vmax.xlane.f32.xlu1 %v559_v20 }
 0x643   :  { %v564_v21 = vpop.xlane.xlu0 %563 }
 0x644   :  { %v566_v22 = vsub.f32 %v556_v16, %v564_v21  ;;  %v561_v23 = vpop.xlane.xlu1 %560 }
 0x645   :  { %v565_v24 = vsub.f32 %v551_v18, %v561_v23 }
 0x646   :  { %v569_v25 = vmul.f32 1.442695, %v566_v22 }
 0x647   :  { %v567_v26 = vmul.f32 1.442695, %v565_v24 }
 0x648   :  { %3681 = vpow2.f32 %v569_v25 }
 0x649   :  { %3683 = vpow2.f32 %v567_v26 }
 0x652   :  { %v3682_v27 = vpop.eup %3681 }
 0x653   :  { %v3684_v28 = vpop.eup %3683  ;;  %v574_v29 = vsel %vm356_vm7, %v3682_v27, 0.0 }
 0x654   :  { %575 = vadd.xlane.f32.xlu1 %v574_v29  ;;  %v571_v32 = vsel %vm356_vm7, %v3684_v28, 0.0 }
 0x655   :  { %572 = vadd.xlane.f32.xlu0 %v571_v32 }
 0x665   :  { %3614 = vrot.lane.b32.xlu1 %v3956_v37, %s3785_s22 }
 0x669   :  { %679 = vrot.lane.b32.xlu1 %v3950_v36, %s4451_s2 }
 0x66b   :  { %3609 = vrot.lane.b32.xlu0 %v3956_v37, %s3787_s23 }
 0x66f   :  { %681 = vrot.lane.b32.xlu0 %v3948_v34, %s4451_s2 }
 0x6e1   :  { %v576_v33 = vpop.xlane.xlu1 %575 }
 0x6e2   :  { %3685 = vrcp.f32 %v576_v33  ;;  %v573_v35 = vpop.xlane.xlu0 %572 }
 0x6e3   :  { %3687 = vrcp.f32 %v573_v35 }
 0x6e5   :  { %v3615_v38 = vpop.permute.xlu1 %3614 }
 0x6e6   :  { %v3610_v39 = vpop.permute.xlu0 %3609  ;;  %v3617_v40 = vunpack.i.h.bf16 %v3615_v38  ;;  %v3616_v42 = vunpack.i.l.bf16 %v3615_v38 }
 0x6e7   :  { %v3612_v45 = vunpack.i.h.bf16 %v3610_v39  ;;  %v3611_v46 = vunpack.i.l.bf16 %v3610_v39 }
 0x6e8   :  { %v3434_v48 = vpack.c.bf16 %v3617_v40, %v3616_v42 }
 0x6e9   :  { %v3430_v47 = vpack.c.bf16 %v3612_v45, %v3611_v46  ;;  %v680_v53 = vpop.permute.xlu1 %679 }
 0x6ea   :  { %v682_v54 = vpop.permute.xlu0 %681 }
 0x6eb   :  { %3431 = vmatprep.subr.bf16.mxu0 %v3430_v47 }
 0x6ec   :  { %v3686_v49 = vpop.eup %3685  ;;  %3433 = vmatpush3.bf16.msra.mxu0 %v3430_v47 }
 0x6ed   :  { %v3688_v50 = vpop.eup %3687  ;;  %3436 = vmatprep.subr.msk.bf16.mxu0 %vm3962_vm6, %v3434_v48  ;;  %v580_v52 = vmul.f32 %v3686_v49, %v3682_v27 }
 0x6ee   :  { %v579_v51 = vmul.f32 %v3688_v50, %v3684_v28 }
 0x6f0   :  { %3203 = vmatprep.mubr.msk.f32.mxu0 %vm356_vm7, %v579_v51 }
 0x6f1   :  { %3204 = vmatmul.mubr.msk.f32.vlgmr.msra.gmra.mrb[2].mxu0 %vm356_vm7, %v580_v52 }
 0x6f2   :  { %3210 = vmatprep.mubr.msk.f32.mxu0 %vm272_vm5, %v680_v53 }
 0x6f5   :  { %3439 = vmatpush3.bf16.xpose.msk.msra.mxu0 %vm3962_vm6, %v3434_v48 }
 0x6fc   :  { %3211 = vmatmul.mubr.msk.f32.vlgmr.msra.gmra.mrb[4].mxu0 %vm272_vm5, %v682_v54 }
 0x7c4   :  { %v4028_v55 = vpop.f32.mrb[2].mxu0 }
 0x7c5   :  { %v4030_v56 = vpop.f32.mrb[3].mxu0 }
 0x7cf   :  { %v3212_v57 = vpop.f32.mrb[4].mxu0 }
 0x7d0   :  { %v767_v58 = vadd.f32 %v3212_v57, %v3975_v43  ;;  %v761_v59 = vpop.f32.mrb[5].mxu0 }
 0x7d1   :  { %v762_v60 = vadd.f32 %v761_v59, %v3980_v44 }
 0x7d2   :  { %v773_v61 = vsel %vm356_vm7, %v767_v58, -inf }
 0x7d3   :  { %774 = vmax.xlane.f32.xlu0 %v773_v61  ;;  %v770_v62 = vsel %vm356_vm7, %v762_v60, -inf }
 0x7d4   :  { %771 = vmax.xlane.f32.xlu1 %v770_v62  ;;  %v1103_v62 = vld [vmem:[%s4423_s6] sm:$0xff] }
 0x860   :  { %v775_v63 = vpop.xlane.xlu0 %774 }
 0x861   :  { %v777_v0 = vsub.f32 %v767_v58, %v775_v63  ;;  %v772_v1 = vpop.xlane.xlu1 %771  ;;  %v1104_v63 = vld [vmem:[%s4423_s6 + $0x8] sm:$0xff] }
 0x862   :  { %v776_v2 = vsub.f32 %v762_v60, %v772_v1  ;;  %v1105_v1 = vld [vmem:[%s4423_s6 + $0x10] sm:$0xff] }
 0x863   :  { %v780_v3 = vmul.f32 1.442695, %v777_v0  ;;  %v3454_v0 = vpack.c.bf16 %v1104_v63, %v1103_v62  ;;  %v1342_v63 = vld [vmem:[%s4427_s10 + $0x30] sm:$0xff] }
 0x864   :  { %v778_v4 = vmul.f32 1.442695, %v776_v2  ;;  %v1106_v2 = vld [vmem:[%s4423_s6 + $0x18] sm:$0xff] }
 0x865   :  { %3689 = vpow2.f32 %v780_v3  ;;  %v3458_v3 = vpack.c.bf16 %v1106_v2, %v1105_v1  ;;  %v2936_v2 = vld [vmem:[%s4426_s9] ss:$0 sm:$0xff] }
 0x866   :  { %3691 = vpow2.f32 %v778_v4 }
 0x86f   :  { %v3690_v5 = vpop.eup %3689 }
 0x870   :  { %v3692_v6 = vpop.eup %3691  ;;  %v785_v7 = vsel %vm356_vm7, %v3690_v5, 0.0 }
 0x871   :  { %786 = vadd.xlane.f32.xlu1 %v785_v7  ;;  %v782_v8 = vsel %vm356_vm7, %v3692_v6, 0.0 }
 0x872   :  { %783 = vadd.xlane.f32.xlu0 %v782_v8 }
 0x882   :  { %3624 = vrot.lane.b32.xlu1 %v3956_v37, %s4450_s24 }
 0x886   :  { %890 = vrot.lane.b32.xlu1 %v3950_v36, %s4446_s25 }
 0x888   :  { %3619 = vrot.lane.b32.xlu0 %v3956_v37, %s4445_s26  ;;  %s4467_s26 = smov 8  }
 0x88c   :  { %892 = vrot.lane.b32.xlu0 %v3948_v34, %s4446_s25 }
 0x8fe   :  { %v787_v9 = vpop.xlane.xlu1 %786 }
 0x8ff   :  { %3693 = vrcp.f32 %v787_v9  ;;  %v784_v10 = vpop.xlane.xlu0 %783 }
 0x900   :  { %3695 = vrcp.f32 %v784_v10  ;;  %v2931_v10 = vld [vmem:[%s4424_s7] ss:$0 sm:$0xff] }
 0x902   :  { %v3625_v11 = vpop.permute.xlu1 %3624 }
 0x903   :  { %v3620_v12 = vpop.permute.xlu0 %3619  ;;  %v3627_v13 = vunpack.i.h.bf16 %v3625_v11  ;;  %v3626_v14 = vunpack.i.l.bf16 %v3625_v11 }
 0x904   :  { %v3622_v15 = vunpack.i.h.bf16 %v3620_v12  ;;  %v3621_v16 = vunpack.i.l.bf16 %v3620_v12 }
 0x905   :  { %v3444_v18 = vpack.c.bf16 %v3627_v13, %v3626_v14 }
 0x906   :  { %v3440_v17 = vpack.c.bf16 %v3622_v15, %v3621_v16  ;;  %v891_v21 = vpop.permute.xlu1 %890 }
 0x907   :  { %v893_v22 = vpop.permute.xlu0 %892 }
 0x908   :  { %3441 = vmatprep.subr.bf16.mxu1 %v3440_v17 }
 0x909   :  { %v3694_v36 = vpop.eup %3693  ;;  %3443 = vmatpush3.bf16.msra.mxu1 %v3440_v17 }
 0x90a   :  { %v3696_v19 = vpop.eup %3695  ;;  %3446 = vmatprep.subr.msk.bf16.mxu1 %vm3962_vm6, %v3444_v18  ;;  %v791_v20 = vmul.f32 %v3694_v36, %v3690_v5 }
 0x90b   :  { %v790_v34 = vmul.f32 %v3696_v19, %v3692_v6 }
 0x90d   :  { %3217 = vmatprep.mubr.msk.f32.mxu1 %vm356_vm7, %v790_v34 }
 0x90e   :  { %3218 = vmatmul.mubr.msk.f32.vlgmr.msra.gmra.mrb[8].mxu1 %vm356_vm7, %v791_v20 }
 0x90f   :  { %3224 = vmatprep.mubr.msk.f32.mxu1 %vm272_vm5, %v891_v21 }
 0x912   :  { %3449 = vmatpush3.bf16.xpose.msk.msra.mxu1 %vm3962_vm6, %v3444_v18 }
 0x919   :  { %3225 = vmatmul.mubr.msk.f32.vlgmr.msra.gmra.mrb[10].mxu1 %vm272_vm5, %v893_v22 }
 0x9e1   :  { %v3219_v23 = vpop.f32.mrb[8].mxu1 }
 0x9e2   :  { %v870_v24 = vpop.f32.mrb[9].mxu1 }
 0x9ec   :  { %v3226_v25 = vpop.f32.mrb[10].mxu1 }
 0x9ed   :  { %v978_v26 = vadd.f32 %v3226_v25, %v3975_v43  ;;  %v972_v27 = vpop.f32.mrb[11].mxu1 }
 0x9ee   :  { %v973_v28 = vadd.f32 %v972_v27, %v3980_v44 }
 0x9ef   :  { %v984_v29 = vsel %vm356_vm7, %v978_v26, -inf }
 0x9f0   :  { %985 = vmax.xlane.f32.xlu0 %v984_v29  ;;  %v981_v32 = vsel %vm356_vm7, %v973_v28, -inf  ;;  %v1245_v29 = vld [vmem:[%s4425_s8 + $0x18] sm:$0xff] }
 0x9f1   :  { %982 = vmax.xlane.f32.xlu1 %v981_v32 }
 0xa7d   :  { %v986_v33 = vpop.xlane.xlu0 %985 }
 0xa7e   :  { %v988_v35 = vsub.f32 %v978_v26, %v986_v33  ;;  %v983_v38 = vpop.xlane.xlu1 %982  ;;  %v1243_v26 = vld [vmem:[%s4425_s8 + $0x8] sm:$0xff]  ;;  %v1336_v33 = vld [vmem:[%s4427_s10] sm:$0xff] }
 0xa7f   :  { %v987_v39 = vsub.f32 %v973_v28, %v983_v38  ;;  %v1244_v28 = vld [vmem:[%s4425_s8 + $0x10] sm:$0xff] }
 0xa80   :  { %v991_v40 = vmul.f32 1.442695, %v988_v35  ;;  %v3466_v32 = vpack.c.bf16 %v1245_v29, %v1244_v28  ;;  %v1337_v35 = vld [vmem:[%s4427_s10 + $0x8] sm:$0xff]  ;;  %v1338_v38 = vld [vmem:[%s4427_s10 + $0x10] sm:$0xff]  ;;  %v2947_v28 = vld [vmem:[%s4421_s4 + $0x38] sm:$0xff] }
 0xa81   :  { %v989_v42 = vmul.f32 1.442695, %v987_v39  ;;  %v3470_v39 = vpack.c.bf16 %v1337_v35, %v1336_v33 }
 0xa82   :  { %3697 = vpow2.f32 %v991_v40  ;;  %v1339_v40 = vld [vmem:[%s4427_s10 + $0x18] sm:$0xff] }
 0xa83   :  { %3699 = vpow2.f32 %v989_v42  ;;  %v3474_v42 = vpack.c.bf16 %v1339_v40, %v1338_v38 }
 0xa8c   :  { %v3698_v45 = vpop.eup %3697 }
 0xa8d   :  { %v3700_v46 = vpop.eup %3699  ;;  %v996_v47 = vsel %vm356_vm7, %v3698_v45, 0.0 }
 0xa8e   :  { %997 = vadd.xlane.f32.xlu1 %v996_v47  ;;  %v993_v48 = vsel %vm356_vm7, %v3700_v46, 0.0 }
 0xa8f   :  { %994 = vadd.xlane.f32.xlu0 %v993_v48 }
 0xa9f   :  { %670 = vrot.lane.b32.xlu1 %v4030_v56, %s4443_s27 }
 0xaa3   :  { %672 = vrot.lane.b32.xlu1 %v4028_v55, %s4443_s27  ;;  %s4468_s27 = smov 40  }
 0xaa5   :  { %3629 = vrot.lane.b32.xlu0 %v3956_v37, %s4442_s28  ;;  %s4469_s28 = smov 16  }
 0xaa7   :  { %883 = vrot.lane.b32.xlu1 %v3219_v23, %s4440_s30 }
 0xaa9   :  { %881 = vrot.lane.b32.xlu0 %v870_v24, %s4440_s30  ;;  %s4462_s30 = sld [smem:[#allocation9_spill]] }
 0xb1b   :  { %v998_v49 = vpop.xlane.xlu1 %997 }
 0xb1c   :  { %3701 = vrcp.f32 %v998_v49  ;;  %v995_v50 = vpop.xlane.xlu0 %994 }
 0xb1d   :  { %3703 = vrcp.f32 %v995_v50 }
 0xb1f   :  { %v671_v51 = vpop.permute.xlu1 %670 }
 0xb20   :  { %677 = vst.msk [vmem:[#allocation2] sm:$0xff] %vm676_vm8, %v671_v51  ;;  %v3630_v52 = vpop.permute.xlu0 %3629 }
 0xb21   :  { %v3632_v53 = vunpack.i.h.bf16 %v3630_v52  ;;  %v3631_v54 = vunpack.i.l.bf16 %v3630_v52 }
 0xb23   :  { %v3450_v55 = vpack.c.bf16 %v3632_v53, %v3631_v54  ;;  %v673_v56 = vpop.permute.xlu1 %672 }
 0xb24   :  { %678 = vst.msk [vmem:[#allocation2 + $0x8] sm:$0xff] %vm676_vm8, %v673_v56  ;;  %v882_v37 = vpop.permute.xlu0 %881 }
 0xb25   :  { %888 = vst.msk [vmem:[#allocation2] sm:$0xff] %vm887_vm9, %v882_v37  ;;  %3451 = vmatprep.subr.bf16.mxu0 %v3450_v55  ;;  %v2935_v37 = vld [vmem:[%s4430_s13] ss:$0 sm:$0xff] }
 0xb26   :  { %v3702_v57 = vpop.eup %3701  ;;  %3453 = vmatpush3.bf16.msra.mxu0 %v3450_v55  ;;  %v2934_v55 = vld [vmem:[%s4429_s12] ss:$0 sm:$0xff] }
 0xb27   :  { %v3704_v58 = vpop.eup %3703  ;;  %v884_v59 = vpop.permute.xlu1 %883  ;;  %v1002_v61 = vmul.f32 %v3702_v57, %v3698_v45  ;;  %3455 = vmatprep.subr.bf16.mxu0 %v3454_v0  ;;  %v1340_v45 = vld [vmem:[%s4427_s10 + $0x20] sm:$0xff] }
 0xb28   :  { %889 = vst.msk [vmem:[#allocation2 + $0x8] sm:$0xff] %vm887_vm9, %v884_v59  ;;  %v1001_v60 = vmul.f32 %v3704_v58, %v3700_v46  ;;  %v1341_v46 = vld [vmem:[%s4427_s10 + $0x28] sm:$0xff] }
 0xb29   :  { %v3478_v47 = vpack.c.bf16 %v1341_v46, %v1340_v45  ;;  %v2942_v45 = vld [vmem:[%s4431_s14] ss:$0 sm:$0xff] }
 0xb2a   :  { %3231 = vmatprep.mubr.msk.f32.mxu0 %vm356_vm7, %v1001_v60 }
 0xb2b   :  { %3232 = vmatmul.mubr.msk.f32.vlgmr.msra.gmra.mrb[6].mxu0 %vm356_vm7, %v1002_v61 }
 0xb2c   :  { %3457 = vmatpush3.bf16.msra.mxu0 %v3454_v0  ;;  %v1343_v0 = vld [vmem:[%s4427_s10 + $0x38] sm:$0xff] }
 0xb2d   :  { %3459 = vmatprep.subr.bf16.mxu0 %v3458_v3  ;;  %v3482_v1 = vpack.c.bf16 %v1343_v0, %v1342_v63 }
 0xb30   :  { %3461 = vmatpush3.bf16.msra.mxu0 %v3458_v3 }
 0xb31   :  { %3471 = vmatprep.subr.bf16.mxu0 %v3470_v39 }
 0xbfe   :  { %v3233_v4 = vpop.f32.mrb[6].mxu0 }
 0xbff   :  { %1094 = vrot.lane.b32.xlu1 %v3233_v4, %s4448_s0  ;;  %v1081_v5 = vpop.f32.mrb[7].mxu0 }
 0xc00   :  { %1092 = vrot.lane.b32.xlu0 %v1081_v5, %s4448_s0 }
 0xc71   :  { %v1095_v6 = vpop.permute.xlu1 %1094 }
 0xc72   :  { %1100 = vst.msk [vmem:[#allocation2 + $0x8] sm:$0xff] %vm1098_vm10, %v1095_v6  ;;  %v1093_v7 = vpop.permute.xlu0 %1092 }
 0xc73   :  { %1099 = vst.msk [vmem:[#allocation2] sm:$0xff] %vm1098_vm10, %v1093_v7 }
 0xc79   :  { %v1102_v9 = vld [vmem:[#allocation2 + $0x8] sm:$0xff] }
 0xc7a   :  { %v1101_v8 = vld [vmem:[#allocation2] sm:$0xff] }
 0xc7b   :  { %3242 = vmatprep.mubr.msk.f32.mxu0 %vm184_vm4, %v1101_v8 }
 0xc7c   :  { %3243 = vmatmul.mubr.msk.f32.vlgmr.msra.gmra.mrb[8].mxu0 %vm184_vm4, %v1102_v9  ;;  %v2939_v9 = vld [vmem:[%s4462_s30] ss:$0 sm:$0xff] }
 0xc7d   :  { %3473 = vmatpush3.bf16.msra.mxu0 %v3470_v39 }
 0xc7e   :  { %3475 = vmatprep.subr.bf16.mxu0 %v3474_v42 }
 0xc81   :  { %3477 = vmatpush3.bf16.msra.mxu0 %v3474_v42 }
 0xc82   :  { %3479 = vmatprep.subr.bf16.mxu0 %v3478_v47 }
 0xc85   :  { %3481 = vmatpush3.bf16.msra.mxu0 %v3478_v47 }
 0xc86   :  { %3483 = vmatprep.subr.bf16.mxu0 %v3482_v1 }
 0xc89   :  { %3485 = vmatpush3.bf16.msra.mxu0 %v3482_v1 }
 0xd4f   :  { %v3244_v11 = vpop.f32.mrb[8].mxu0 }
 0xd50   :  { %v1192_v12 = vadd.f32 %v3244_v11, %v2931_v10  ;;  %v1186_v13 = vpop.f32.mrb[9].mxu0 }
 0xd51   :  { %v1187_v14 = vadd.f32 %v2931_v10, %v1186_v13 }
 0xd52   :  { %v1196_v15 = vadd.f32 %v1192_v12, %v3939_v31 }
 0xd53   :  { %v1195_v16 = vadd.f32 %v1187_v14, %v3937_v30  ;;  %v1242_v30 = vld [vmem:[%s4425_s8] sm:$0xff] }
 0xd54   :  { %v1202_v17 = vsel %vm184_vm4, %v1196_v15, 0.0  ;;  %v3462_v27 = vpack.c.bf16 %v1243_v26, %v1242_v30  ;;  %v2945_v30 = vld [vmem:[%s4421_s4 + $0x28] sm:$0xff] }
 0xd55   :  { %1203 = vadd.xlane.f32.xlu1 %v1202_v17  ;;  %v1199_v18 = vsel %vm184_vm4, %v1195_v16, 0.0 }
 0xd56   :  { %1200 = vadd.xlane.f32.xlu0 %v1199_v18  ;;  %3463 = vmatprep.subr.bf16.mxu1 %v3462_v27 }
 0xd57   :  { %3465 = vmatpush3.bf16.msra.mxu1 %v3462_v27  ;;  %v2946_v27 = vld [vmem:[%s4421_s4 + $0x30] sm:$0xff] }
 0xd58   :  { %3467 = vmatprep.subr.bf16.mxu1 %v3466_v32  ;;  %v3490_v29 = vpack.c.bf16 %v2947_v28, %v2946_v27 }
 0xd5b   :  { %3469 = vmatpush3.bf16.msra.mxu1 %v3466_v32 }
 0xde2   :  { %v1204_v36 = vpop.xlane.xlu1 %1203 }
 0xde3   :  { %v1207_v19 = vmul.f32 0.03125, %v1204_v36  ;;  %v1201_v34 = vpop.xlane.xlu0 %1200 }
 0xde4   :  { %v1206_v20 = vmul.f32 0.03125, %v1201_v34 }
 0xde5   :  { %v1209_v21 = vsub.f32 %v1196_v15, %v1207_v19 }
 0xde6   :  { %v1208_v22 = vsub.f32 %v1195_v16, %v1206_v20 }
 0xde7   :  { %v1211_v25 = vmul.f32 %v1209_v21, %v1209_v21 }
 0xde8   :  { %v1210_v23 = vmul.f32 %v1208_v22, %v1208_v22 }
 0xde9   :  { %v1215_v31 = vsel %vm184_vm4, %v1211_v25, 0.0 }
 0xdea   :  { %v1212_v24 = vsel %vm184_vm4, %v1210_v23, 0.0 }
 0xdeb   :  { %1213 = vadd.xlane.f32.xlu0 %v1212_v24 }
 0xdef   :  { %1216 = vadd.xlane.f32.xlu0 %v1215_v31  ;;  %v2944_v31 = vld [vmem:[%s4421_s4 + $0x20] sm:$0xff] }
 0xdf0   :  { %v3486_v26 = vpack.c.bf16 %v2945_v30, %v2944_v31 }
 0xdf2   :  { %3487 = vmatprep.subr.bf16.mxu1 %v3486_v26 }
 0xe78   :  { %v1214_v48 = vpop.xlane.xlu0 %1213 }
 0xe79   :  { %v1218_v49 = vmul.f32 0.03125, %v1214_v48 }
 0xe7b   :  { %v1220_v50 = vadd.f32 1e-05, %v1218_v49  ;;  %v2943_v49 = vld [vmem:[%s4432_s15] ss:$0 sm:$0xff] }
 0xe7c   :  { %v1217_v51 = vpop.xlane.xlu0 %1216 }
 0xe7d   :  { %3705 = vrsqrt.f32 %v1220_v50  ;;  %v1219_v52 = vmul.f32 0.03125, %v1217_v51 }
 0xe7f   :  { %v1221_v53 = vadd.f32 1e-05, %v1219_v52 }
 0xe81   :  { %3707 = vrsqrt.f32 %v1221_v53 }
 0xe87   :  { %v3706_v54 = vpop.eup %3705 }
 0xe88   :  { %v1224_v56 = vmul.f32 %v3706_v54, %v1208_v22  ;;  %v2949_v54 = vld [vmem:[%s4422_s5 + $0x1] ss:$0 sm:$0xff]  ;;  %s4463_s5 = smov 112  }
 0xe8a   :  { %v1232_v57 = vmul.f32 %v2934_v55, %v1224_v56 }
 0xe8b   :  { %v3708_v58 = vpop.eup %3707 }
 0xe8c   :  { %v1225_v59 = vmul.f32 %v3708_v58, %v1209_v21  ;;  %v1240_v60 = vadd.f32 %v2935_v37, %v1232_v57 }
 0xe8e   :  { %v1233_v61 = vmul.f32 %v2934_v55, %v1225_v59  ;;  %3253 = vmatprep.mubr.msk.f32.mxu1 %vm184_vm4, %v1240_v60 }
 0xe90   :  { %v1241_v62 = vadd.f32 %v2935_v37, %v1233_v61 }
 0xe92   :  { %3254 = vmatmul.mubr.msk.f32.vlgmr.msra.gmra.mrb[12].mxu1 %vm184_vm4, %v1241_v62 }
 0xe93   :  { %3489 = vmatpush3.bf16.msra.mxu1 %v3486_v26 }
 0xe94   :  { %3491 = vmatprep.subr.bf16.mxu1 %v3490_v29 }
 0xe97   :  { %3493 = vmatpush3.bf16.msra.mxu1 %v3490_v29 }
 0xf65   :  { %v3255_v3 = vpop.f32.mrb[12].mxu1 }
 0xf66   :  { %v1331_v4 = vadd.f32 %v3255_v3, %v2936_v2  ;;  %v1325_v5 = vpop.f32.mrb[13].mxu1 }
 0xf67   :  { %v1326_v6 = vadd.f32 %v2936_v2, %v1325_v5 }
 0xf68   :  { %v1335_v8 = vmax.f32 %v1331_v4, 0.0 }
 0xf69   :  { %v1334_v7 = vmax.f32 %v1326_v6, 0.0 }
 0xf6b   :  { %3272 = vmatprep.mubr.msk.f32.mxu0 %vm1351_vm11, %v1334_v7 }
 0xf6c   :  { %3273 = vmatmul.mubr.msk.f32.vlgmr.msra.gmra.mrb[10].mxu0 %vm1351_vm11, %v1335_v8 }
0x103f   :  { %v3274_v10 = vpop.f32.mrb[10].mxu0 }
0x1040   :  { %v1430_v11 = vadd.f32 %v3274_v10, %v2939_v9  ;;  %v1424_v12 = vpop.f32.mrb[11].mxu0 }
0x1041   :  { %v1425_v13 = vadd.f32 %v2939_v9, %v1424_v12 }
0x1042   :  { %v1434_v14 = vadd.f32 %v1430_v11, %v1241_v62 }
0x1043   :  { %v1433_v15 = vadd.f32 %v1425_v13, %v1240_v60 }
0x1044   :  { %v1440_v16 = vsel %vm184_vm4, %v1434_v14, 0.0 }
0x1045   :  { %1441 = vadd.xlane.f32.xlu0 %v1440_v16  ;;  %v1437_v17 = vsel %vm184_vm4, %v1433_v15, 0.0 }
0x1046   :  { %1438 = vadd.xlane.f32.xlu1 %v1437_v17 }
0x10d2   :  { %v1442_v18 = vpop.xlane.xlu0 %1441 }
0x10d3   :  { %v1444_v36 = vmul.f32 0.03125, %v1442_v18  ;;  %v1439_v19 = vpop.xlane.xlu1 %1438 }
0x10d4   :  { %v1443_v34 = vmul.f32 0.03125, %v1439_v19 }
0x10d5   :  { %v1446_v20 = vsub.f32 %v1434_v14, %v1444_v36 }
0x10d6   :  { %v1445_v21 = vsub.f32 %v1433_v15, %v1443_v34 }
0x10d7   :  { %v1448_v22 = vmul.f32 %v1446_v20, %v1446_v20 }
0x10d8   :  { %v1447_v23 = vmul.f32 %v1445_v21, %v1445_v21 }
0x10d9   :  { %v1452_v24 = vsel %vm184_vm4, %v1448_v22, 0.0 }
0x10da   :  { %1453 = vadd.xlane.f32.xlu0 %v1452_v24  ;;  %v1449_v25 = vsel %vm184_vm4, %v1447_v23, 0.0 }
0x10db   :  { %1450 = vadd.xlane.f32.xlu1 %v1449_v25 }
0x1167   :  { %v1454_v32 = vpop.xlane.xlu0 %1453 }
0x1168   :  { %v1456_v33 = vmul.f32 0.03125, %v1454_v32  ;;  %v1451_v35 = vpop.xlane.xlu1 %1450 }
0x1169   :  { %v1455_v38 = vmul.f32 0.03125, %v1451_v35 }
0x116a   :  { %v1458_v39 = vadd.f32 1e-05, %v1456_v33 }
0x116b   :  { %v1457_v40 = vadd.f32 1e-05, %v1455_v38 }
0x116c   :  { %3709 = vrsqrt.f32 %v1458_v39 }
0x116d   :  { %3711 = vrsqrt.f32 %v1457_v40 }
0x1176   :  { %v3710_v42 = vpop.eup %3709 }
0x1177   :  { %v3712_v46 = vpop.eup %3711  ;;  %v1462_v47 = vmul.f32 %v3710_v42, %v1446_v20 }
0x1178   :  { %v1461_v48 = vmul.f32 %v3712_v46, %v1445_v21 }
0x1179   :  { %v1470_v50 = vmul.f32 %v2942_v45, %v1462_v47 }
0x117a   :  { %v1469_v51 = vmul.f32 %v2942_v45, %v1461_v48 }
0x117b   :  { %v4177_v53 = vadd.f32 %v2943_v49, %v1470_v50 }
0x117c   :  { %v4175_v52 = vadd.f32 %v2943_v49, %v1469_v51 }
0x117e   :  { %3283 = vmatprep.mubr.msk.f32.mxu1 %vm184_vm4, %v4175_v52 }
0x117f   :  { %3284 = vmatmul.mubr.msk.f32.vlgmr.msra.gmra.mrb[14].mxu1 %vm184_vm4, %v4177_v53 }
0x1252   :  { %v3285_v55 = vpop.f32.mrb[14].mxu1 }
0x1253   :  { %v4186_v56 = vadd.f32 %v3285_v55, %v2949_v54  ;;  %v1564_v37 = vpop.f32.mrb[15].mxu1 }
0x1254   :  { %v4188_v57 = vadd.f32 %v2949_v54, %v1564_v37 }
0x1256   :  { %3290 = vmatprep.mubr.msk.f32.mxu1 %vm272_vm5, %v4188_v57  ;;  %v4194_v58 = vpack.i.bf16 %v4186_v56, %v4188_v57 }
0x1258   :  { %3639 = vrot.lane.b32.xlu0 %v4194_v58, %s3782_s20  ;;  %3634 = vrot.lane.b32.xlu1 %v4194_v58, %s3781_s3  ;;  %s4470_s3 = smov 24  }
0x125c   :  { %1773 = vrot.lane.b32.xlu1 %v4188_v57, %s3783_s21 }
0x1260   :  { %1775 = vrot.lane.b32.xlu1 %v4186_v56, %s3783_s21 }
0x12ca   :  { %v3640_v59 = vpop.permute.xlu0 %3639  ;;  %v3635_v60 = vpop.permute.xlu1 %3634 }
0x12cb   :  { %v3642_v61 = vunpack.i.h.bf16 %v3640_v59  ;;  %v3641_v62 = vunpack.i.l.bf16 %v3640_v59  ;;  %v3637_v63 = vunpack.i.h.bf16 %v3635_v60  ;;  %v3636_v0 = vunpack.i.l.bf16 %v3635_v60 }
0x12cd   :  { %v3494_v1 = vpack.c.bf16 %v3637_v63, %v3636_v0  ;;  %v3504_v2 = vpack.c.bf16 %v3642_v61, %v3641_v62 }
0x12ce   :  { %v1774_v3 = vpop.permute.xlu1 %1773 }
0x12cf   :  { %3496 = vmatprep.subr.msk.bf16.mxu1 %vm3962_vm6, %v3494_v1 }
0x12d0   :  { %3499 = vmatpush3.bf16.xpose.msk.msra.mxu1 %vm3962_vm6, %v3494_v1 }
0x12d1   :  { %3506 = vmatprep.subr.msk.bf16.mxu1 %vm3962_vm6, %v3504_v2 }
0x12d2   :  { %v1776_v4 = vpop.permute.xlu1 %1775 }
0x12d7   :  { %3291 = vmatmul.mubr.msk.f32.vlgmr.msra.gmra.mrb[16].mxu1 %vm272_vm5, %v4186_v56 }
0x12d8   :  { %3509 = vmatpush3.bf16.xpose.msk.msra.mxu1 %vm3962_vm6, %v3504_v2  ;;  %3304 = vmatprep.mubr.msk.f32.mxu1 %vm272_vm5, %v1774_v3 }
0x12df   :  { %3305 = vmatmul.mubr.msk.f32.vlgmr.msra.gmra.mrb[18].mxu1 %vm272_vm5, %v1776_v4 }
0x13aa   :  { %v3292_v5 = vpop.f32.mrb[16].mxu1 }
0x13ab   :  { %v1659_v6 = vadd.f32 %v3292_v5, %v3975_v43  ;;  %v1653_v7 = vpop.f32.mrb[17].mxu1 }
0x13ac   :  { %v1654_v8 = vadd.f32 %v1653_v7, %v3980_v44 }
0x13ad   :  { %v1665_v9 = vsel %vm356_vm7, %v1659_v6, -inf }
0x13ae   :  { %1666 = vmax.xlane.f32.xlu1 %v1665_v9  ;;  %v1662_v10 = vsel %vm356_vm7, %v1654_v8, -inf }
0x13af   :  { %1663 = vmax.xlane.f32.xlu0 %v1662_v10  ;;  %v3753_v10 = vld [vmem:[%s4461_s19 + $0x8] sm:$0xff] }
0x13b2   :  { %v3306_v11 = vpop.f32.mrb[18].mxu1 }
0x13b3   :  { %v1855_v12 = vpop.f32.mrb[19].mxu1  ;;  %v1861_v14 = vadd.f32 %v3306_v11, %v3975_v43 }
0x13b4   :  { %v1856_v13 = vadd.f32 %v1855_v12, %v3980_v44 }
0x13b5   :  { %v1867_v16 = vsel %vm356_vm7, %v1861_v14, -inf }
0x13b6   :  { %v1864_v15 = vsel %vm356_vm7, %v1856_v13, -inf }
0x13b7   :  { %1865 = vmax.xlane.f32.xlu0 %v1864_v15 }
0x13bb   :  { %1868 = vmax.xlane.f32.xlu0 %v1867_v16 }
0x13bf   :  { %3644 = vrot.lane.b32.xlu1 %v4194_v58, %s3784_s11 }
0x143b   :  { %v1667_v17 = vpop.xlane.xlu1 %1666 }
0x143c   :  { %v1669_v18 = vsub.f32 %v1659_v6, %v1667_v17  ;;  %v1664_v36 = vpop.xlane.xlu0 %1663 }
0x143d   :  { %v1668_v19 = vsub.f32 %v1654_v8, %v1664_v36 }
0x143e   :  { %v1672_v34 = vmul.f32 1.442695, %v1669_v18 }
0x143f   :  { %v1670_v20 = vmul.f32 1.442695, %v1668_v19  ;;  %v3645_v21 = vpop.permute.xlu1 %3644 }
0x1440   :  { %3713 = vpow2.f32 %v1672_v34  ;;  %v3647_v44 = vunpack.i.h.bf16 %v3645_v21  ;;  %v3646_v22 = vunpack.i.l.bf16 %v3645_v21 }
0x1441   :  { %3715 = vpow2.f32 %v1670_v20 }
0x1442   :  { %v3500_v43 = vpack.c.bf16 %v3647_v44, %v3646_v22 }
0x1444   :  { %3501 = vmatprep.subr.bf16.mxu0 %v3500_v43  ;;  %v1866_v23 = vpop.xlane.xlu0 %1865 }
0x1445   :  { %3503 = vmatpush3.bf16.msra.mxu0 %v3500_v43  ;;  %v1870_v33 = vsub.f32 %v1856_v13, %v1866_v23  ;;  %v3754_v13 = vld [vmem:[%s4461_s19] sm:$0xff]  ;;  %s4464_s19 = smov 72  }
0x1447   :  { %v1872_v35 = vmul.f32 1.442695, %v1870_v33 }
0x1448   :  { %v1869_v24 = vpop.xlane.xlu0 %1868 }
0x1449   :  { %v1871_v25 = vsub.f32 %v1861_v14, %v1869_v24 }
0x144a   :  { %v3714_v31 = vpop.eup %3713 }
0x144b   :  { %v3716_v30 = vpop.eup %3715  ;;  %v1874_v26 = vmul.f32 1.442695, %v1871_v25  ;;  %v1677_v27 = vsel %vm356_vm7, %v3714_v31, 0.0 }
0x144c   :  { %1678 = vadd.xlane.f32.xlu0 %v1677_v27  ;;  %v1674_v28 = vsel %vm356_vm7, %v3716_v30, 0.0 }
0x144d   :  { %3717 = vpow2.f32 %v1874_v26  ;;  %1675 = vadd.xlane.f32.xlu1 %v1674_v28 }
0x144e   :  { %3719 = vpow2.f32 %v1872_v35 }
0x1457   :  { %v3718_v29 = vpop.eup %3717 }
0x1458   :  { %v1879_v32 = vsel %vm356_vm7, %v3718_v29, 0.0  ;;  %v3720_v38 = vpop.eup %3719 }
0x1459   :  { %1880 = vadd.xlane.f32.xlu0 %v1879_v32  ;;  %v1876_v39 = vsel %vm356_vm7, %v3720_v38, 0.0 }
0x145e   :  { %3654 = vrot.lane.b32.xlu1 %v4194_v58, %s3785_s22  ;;  %s4465_s22 = smov 104  }
0x146f   :  { %3649 = vrot.lane.b32.xlu0 %v4194_v58, %s3787_s23  ;;  %s4466_s23 = smov 48  }
0x1473   :  { %1985 = vrot.lane.b32.xlu0 %v4186_v56, %s4463_s5 }
0x1482   :  { %1877 = vadd.xlane.f32.xlu1 %v1876_v39 }
0x1493   :  { %1983 = vrot.lane.b32.xlu1 %v4188_v57, %s4463_s5 }
0x14d9   :  { %v1679_v40 = vpop.xlane.xlu0 %1678 }
0x14da   :  { %3721 = vrcp.f32 %v1679_v40  ;;  %v1676_v42 = vpop.xlane.xlu1 %1675 }
0x14db   :  { %3723 = vrcp.f32 %v1676_v42 }
0x14de   :  { %v3655_v50 = vpop.permute.xlu1 %3654 }
0x14df   :  { %v3657_v54 = vunpack.i.h.bf16 %v3655_v50  ;;  %v3656_v55 = vunpack.i.l.bf16 %v3655_v50 }
0x14e1   :  { %v3514_v61 = vpack.c.bf16 %v3657_v54, %v3656_v55 }
0x14e4   :  { %v3722_v45 = vpop.eup %3721 }
0x14e5   :  { %v3724_v46 = vpop.eup %3723  ;;  %v1683_v49 = vmul.f32 %v3722_v45, %v3714_v31 }
0x14e6   :  { %v1881_v47 = vpop.xlane.xlu0 %1880  ;;  %v1682_v48 = vmul.f32 %v3724_v46, %v3716_v30 }
0x14e7   :  { %3725 = vrcp.f32 %v1881_v47 }
0x14e8   :  { %3297 = vmatprep.mubr.msk.f32.mxu0 %vm356_vm7, %v1682_v48 }
0x14e9   :  { %3298 = vmatmul.mubr.msk.f32.vlgmr.msra.gmra.mrb[12].mxu0 %vm356_vm7, %v1683_v49 }
0x14ea   :  { %v3650_v51 = vpop.permute.xlu0 %3649 }
0x14eb   :  { %v3652_v37 = vunpack.i.h.bf16 %v3650_v51  ;;  %v3651_v59 = vunpack.i.l.bf16 %v3650_v51 }
0x14ed   :  { %v3510_v60 = vpack.c.bf16 %v3652_v37, %v3651_v59 }
0x14ee   :  { %v1986_v4 = vpop.permute.xlu0 %1985 }
0x14ef   :  { %3511 = vmatprep.subr.bf16.mxu0 %v3510_v60 }
0x14f0   :  { %3513 = vmatpush3.bf16.msra.mxu0 %v3510_v60 }
0x14f1   :  { %3516 = vmatprep.subr.msk.bf16.mxu0 %vm3962_vm6, %v3514_v61  ;;  %v3726_v63 = vpop.eup %3725 }
0x14f2   :  { %v1885_v2 = vmul.f32 %v3726_v63, %v3718_v29 }
0x150f   :  { %v1878_v62 = vpop.xlane.xlu1 %1877 }
0x1510   :  { %3727 = vrcp.f32 %v1878_v62 }
0x1513   :  { %v1984_v3 = vpop.permute.xlu1 %1983 }
0x151a   :  { %v3728_v0 = vpop.eup %3727 }
0x151b   :  { %v1884_v1 = vmul.f32 %v3728_v0, %v3720_v38 }
0x151d   :  { %3311 = vmatprep.mubr.msk.f32.mxu0 %vm356_vm7, %v1884_v1 }
0x151e   :  { %3312 = vmatmul.mubr.msk.f32.vlgmr.msra.gmra.mrb[14].mxu0 %vm356_vm7, %v1885_v2 }
0x151f   :  { %3519 = vmatpush3.bf16.xpose.msk.msra.mxu0 %vm3962_vm6, %v3514_v61  ;;  %3318 = vmatprep.mubr.msk.f32.mxu0 %vm272_vm5, %v1984_v3 }
0x1526   :  { %3319 = vmatmul.mubr.msk.f32.vlgmr.msra.gmra.mrb[16].mxu0 %vm272_vm5, %v1986_v4 }
0x15bc   :  { %v3299_v5 = vpop.f32.mrb[12].mxu0 }
0x15bd   :  { %1772 = vst.msk [vmem:[#allocation2 + $0x8] sm:$0xff] %vm272_vm5, %v3299_v5  ;;  %v1762_v6 = vpop.f32.mrb[13].mxu0 }
0x15be   :  { %1771 = vst.msk [vmem:[#allocation2] sm:$0xff] %vm272_vm5, %v1762_v6 }
0x15f1   :  { %v4250_v7 = vpop.f32.mrb[14].mxu0 }
0x15f2   :  { %v4252_v8 = vpop.f32.mrb[15].mxu0 }
0x15f9   :  { %v3320_v9 = vpop.f32.mrb[16].mxu0 }
0x15fa   :  { %v2071_v11 = vadd.f32 %v3753_v10, %v3320_v9  ;;  %v2065_v12 = vpop.f32.mrb[17].mxu0 }
0x15fb   :  { %v2066_v14 = vadd.f32 %v3754_v13, %v2065_v12 }
0x15fc   :  { %v2077_v15 = vsel %vm356_vm7, %v2071_v11, -inf }
0x15fd   :  { %2078 = vmax.xlane.f32.xlu0 %v2077_v15  ;;  %v2074_v16 = vsel %vm356_vm7, %v2066_v14, -inf }
0x15fe   :  { %2075 = vmax.xlane.f32.xlu1 %v2074_v16  ;;  %v2978_v16 = vld [vmem:[%s4423_s6 + $0x30] sm:$0xff] }
0x168a   :  { %v2079_v17 = vpop.xlane.xlu0 %2078 }
0x168b   :  { %v2081_v18 = vsub.f32 %v2071_v11, %v2079_v17  ;;  %v2076_v36 = vpop.xlane.xlu1 %2075  ;;  %v2979_v17 = vld [vmem:[%s4423_s6 + $0x38] sm:$0xff] }
0x168c   :  { %v2080_v19 = vsub.f32 %v2066_v14, %v2076_v36  ;;  %v2977_v14 = vld [vmem:[%s4423_s6 + $0x28] sm:$0xff] }
0x168d   :  { %v2084_v34 = vmul.f32 1.442695, %v2081_v18  ;;  %v3538_v18 = vpack.c.bf16 %v2979_v17, %v2978_v16 }
0x168e   :  { %v2082_v20 = vmul.f32 1.442695, %v2080_v19 }
0x168f   :  { %3729 = vpow2.f32 %v2084_v34 }
0x1690   :  { %3731 = vpow2.f32 %v2082_v20 }
0x1699   :  { %v3730_v21 = vpop.eup %3729 }
0x169a   :  { %v3732_v44 = vpop.eup %3731  ;;  %v2089_v22 = vsel %vm356_vm7, %v3730_v21, 0.0 }
0x169b   :  { %2090 = vadd.xlane.f32.xlu1 %v2089_v22  ;;  %v2086_v43 = vsel %vm356_vm7, %v3732_v44, 0.0  ;;  %v2981_v22 = vld [vmem:[%s4424_s7 + $0x1] ss:$0 sm:$0xff] }
0x169c   :  { %2087 = vadd.xlane.f32.xlu0 %v2086_v43 }
0x16ac   :  { %3664 = vrot.lane.b32.xlu1 %v4194_v58, %s4464_s19 }
0x16b0   :  { %2193 = vrot.lane.b32.xlu1 %v4188_v57, %s4465_s22 }
0x16b2   :  { %3659 = vrot.lane.b32.xlu0 %v4194_v58, %s4466_s23 }
0x16b6   :  { %2195 = vrot.lane.b32.xlu0 %v4186_v56, %s4465_s22 }
0x1728   :  { %v2091_v23 = vpop.xlane.xlu1 %2090 }
0x1729   :  { %3733 = vrcp.f32 %v2091_v23  ;;  %v2088_v24 = vpop.xlane.xlu0 %2087 }
0x172a   :  { %3735 = vrcp.f32 %v2088_v24 }
0x172c   :  { %v3665_v25 = vpop.permute.xlu1 %3664 }
0x172d   :  { %v3660_v31 = vpop.permute.xlu0 %3659  ;;  %v3667_v30 = vunpack.i.h.bf16 %v3665_v25  ;;  %v3666_v26 = vunpack.i.l.bf16 %v3665_v25 }
0x172e   :  { %v3662_v27 = vunpack.i.h.bf16 %v3660_v31  ;;  %v3661_v28 = vunpack.i.l.bf16 %v3660_v31 }
0x172f   :  { %v3524_v32 = vpack.c.bf16 %v3667_v30, %v3666_v26 }
0x1730   :  { %v3520_v29 = vpack.c.bf16 %v3662_v27, %v3661_v28  ;;  %v2194_v38 = vpop.permute.xlu1 %2193 }
0x1731   :  { %v2196_v39 = vpop.permute.xlu0 %2195 }
0x1732   :  { %3521 = vmatprep.subr.bf16.mxu1 %v3520_v29 }
0x1733   :  { %v3734_v57 = vpop.eup %3733  ;;  %3523 = vmatpush3.bf16.msra.mxu1 %v3520_v29 }
0x1734   :  { %v3736_v33 = vpop.eup %3735  ;;  %3526 = vmatprep.subr.msk.bf16.mxu1 %vm3962_vm6, %v3524_v32  ;;  %v2095_v35 = vmul.f32 %v3734_v57, %v3730_v21 }
0x1735   :  { %v2094_v56 = vmul.f32 %v3736_v33, %v3732_v44 }
0x1737   :  { %3325 = vmatprep.mubr.msk.f32.mxu1 %vm356_vm7, %v2094_v56 }
0x1738   :  { %3326 = vmatmul.mubr.msk.f32.vlgmr.msra.gmra.mrb[20].mxu1 %vm356_vm7, %v2095_v35 }
0x1739   :  { %3332 = vmatprep.mubr.msk.f32.mxu1 %vm272_vm5, %v2194_v38 }
0x173c   :  { %3529 = vmatpush3.bf16.xpose.msk.msra.mxu1 %vm3962_vm6, %v3524_v32 }
0x1743   :  { %3333 = vmatmul.mubr.msk.f32.vlgmr.msra.gmra.mrb[22].mxu1 %vm272_vm5, %v2196_v39 }
0x180b   :  { %v3327_v40 = vpop.f32.mrb[20].mxu1 }
0x180c   :  { %v2174_v42 = vpop.f32.mrb[21].mxu1 }
0x1816   :  { %v3334_v45 = vpop.f32.mrb[22].mxu1 }
0x1817   :  { %v2281_v46 = vadd.f32 %v3753_v10, %v3334_v45  ;;  %v2275_v47 = vpop.f32.mrb[23].mxu1  ;;  %v2990_v45 = vld [vmem:[%s4425_s8 + $0x30] sm:$0xff] }
0x1818   :  { %v2276_v48 = vadd.f32 %v3754_v13, %v2275_v47  ;;  %v2976_v13 = vld [vmem:[%s4423_s6 + $0x20] sm:$0xff] }
0x1819   :  { %v2287_v49 = vsel %vm356_vm7, %v2281_v46, -inf  ;;  %v3534_v15 = vpack.c.bf16 %v2977_v14, %v2976_v13  ;;  %v2993_v14 = vld [vmem:[%s4426_s9 + $0x1] ss:$0 sm:$0xff] }
0x181a   :  { %2288 = vmax.xlane.f32.xlu0 %v2287_v49  ;;  %v2284_v50 = vsel %vm356_vm7, %v2276_v48, -inf  ;;  %v2997_v49 = vld [vmem:[%s4427_s10 + $0x48] sm:$0xff] }
0x181b   :  { %2285 = vmax.xlane.f32.xlu1 %v2284_v50  ;;  %v2998_v50 = vld [vmem:[%s4427_s10 + $0x50] sm:$0xff] }
0x18a7   :  { %v2289_v51 = vpop.xlane.xlu0 %2288 }
0x18a8   :  { %v2291_v54 = vsub.f32 %v2281_v46, %v2289_v51  ;;  %v2286_v55 = vpop.xlane.xlu1 %2285  ;;  %v2991_v46 = vld [vmem:[%s4425_s8 + $0x38] sm:$0xff] }
0x18a9   :  { %v2290_v41 = vsub.f32 %v2276_v48, %v2286_v55  ;;  %v3546_v47 = vpack.c.bf16 %v2991_v46, %v2990_v45  ;;  %v2996_v48 = vld [vmem:[%s4427_s10 + $0x40] sm:$0xff] }
0x18aa   :  { %v2294_v37 = vmul.f32 1.442695, %v2291_v54  ;;  %v3550_v51 = vpack.c.bf16 %v2997_v49, %v2996_v48  ;;  %v2999_v54 = vld [vmem:[%s4427_s10 + $0x58] sm:$0xff] }
0x18ab   :  { %v2292_v59 = vmul.f32 1.442695, %v2290_v41  ;;  %v3554_v55 = vpack.c.bf16 %v2999_v54, %v2998_v50  ;;  %v3000_v41 = vld [vmem:[%s4427_s10 + $0x60] sm:$0xff] }
0x18ac   :  { %3737 = vpow2.f32 %v2294_v37  ;;  %v3001_v37 = vld [vmem:[%s4427_s10 + $0x68] sm:$0xff] }
0x18ad   :  { %3739 = vpow2.f32 %v2292_v59  ;;  %v3558_v59 = vpack.c.bf16 %v3001_v37, %v3000_v41  ;;  %v3011_v37 = vld [vmem:[%s4432_s15 + $0x1] ss:$0 sm:$0xff] }
0x18b6   :  { %v3738_v60 = vpop.eup %3737 }
0x18b7   :  { %v3740_v61 = vpop.eup %3739  ;;  %v2299_v62 = vsel %vm356_vm7, %v3738_v60, 0.0 }
0x18b8   :  { %2300 = vadd.xlane.f32.xlu1 %v2299_v62  ;;  %v2296_v63 = vsel %vm356_vm7, %v3740_v61, 0.0 }
0x18b9   :  { %2297 = vadd.xlane.f32.xlu0 %v2296_v63 }
0x18c9   :  { %1975 = vrot.lane.b32.xlu1 %v4252_v8, %s4467_s26 }
0x18cd   :  { %1977 = vrot.lane.b32.xlu1 %v4250_v7, %s4467_s26 }
0x18cf   :  { %3669 = vrot.lane.b32.xlu0 %v4194_v58, %s4468_s27 }
0x18d1   :  { %2187 = vrot.lane.b32.xlu1 %v3327_v40, %s4469_s28  ;;  %v2989_v40 = vld [vmem:[%s4425_s8 + $0x28] sm:$0xff] }
0x18d3   :  { %2185 = vrot.lane.b32.xlu0 %v2174_v42, %s4469_s28 }
0x1945   :  { %v2301_v0 = vpop.xlane.xlu1 %2300 }
0x1946   :  { %3741 = vrcp.f32 %v2301_v0  ;;  %v2298_v1 = vpop.xlane.xlu0 %2297 }
0x1947   :  { %3743 = vrcp.f32 %v2298_v1 }
0x1949   :  { %v1976_v2 = vpop.permute.xlu1 %1975 }
0x194a   :  { %1981 = vst.msk [vmem:[#allocation2] sm:$0xff] %vm676_vm8, %v1976_v2  ;;  %v3670_v3 = vpop.permute.xlu0 %3669 }
0x194b   :  { %v3672_v4 = vunpack.i.h.bf16 %v3670_v3  ;;  %v3671_v5 = vunpack.i.l.bf16 %v3670_v3  ;;  %v2986_v3 = vld [vmem:[%s4429_s12 + $0x1] ss:$0 sm:$0xff] }
0x194d   :  { %v3530_v6 = vpack.c.bf16 %v3672_v4, %v3671_v5  ;;  %v1978_v8 = vpop.permute.xlu1 %1977  ;;  %v2987_v5 = vld [vmem:[%s4430_s13 + $0x1] ss:$0 sm:$0xff] }
0x194e   :  { %1982 = vst.msk [vmem:[#allocation2 + $0x8] sm:$0xff] %vm676_vm8, %v1978_v8  ;;  %v2186_v7 = vpop.permute.xlu0 %2185 }
0x194f   :  { %2191 = vst.msk [vmem:[#allocation2] sm:$0xff] %vm887_vm9, %v2186_v7  ;;  %3531 = vmatprep.subr.bf16.mxu0 %v3530_v6 }
0x1950   :  { %v3742_v58 = vpop.eup %3741  ;;  %3533 = vmatpush3.bf16.msra.mxu0 %v3530_v6 }
0x1951   :  { %v3744_v9 = vpop.eup %3743  ;;  %v2188_v10 = vpop.permute.xlu1 %2187  ;;  %v2305_v12 = vmul.f32 %v3742_v58, %v3738_v60  ;;  %3535 = vmatprep.subr.bf16.mxu0 %v3534_v15 }
0x1952   :  { %2192 = vst.msk [vmem:[#allocation2 + $0x8] sm:$0xff] %vm887_vm9, %v2188_v10  ;;  %v2304_v11 = vmul.f32 %v3744_v9, %v3740_v61 }
0x1954   :  { %3339 = vmatprep.mubr.msk.f32.mxu0 %vm356_vm7, %v2304_v11  ;;  %v3002_v11 = vld [vmem:[%s4427_s10 + $0x70] sm:$0xff] }
0x1955   :  { %3340 = vmatmul.mubr.msk.f32.vlgmr.msra.gmra.mrb[18].mxu0 %vm356_vm7, %v2305_v12  ;;  %v3003_v12 = vld [vmem:[%s4427_s10 + $0x78] sm:$0xff] }
0x1956   :  { %3537 = vmatpush3.bf16.msra.mxu0 %v3534_v15  ;;  %v3562_v13 = vpack.c.bf16 %v3003_v12, %v3002_v11 }
0x1957   :  { %3539 = vmatprep.subr.bf16.mxu0 %v3538_v18 }
0x195a   :  { %3541 = vmatpush3.bf16.msra.mxu0 %v3538_v18 }
0x195b   :  { %3551 = vmatprep.subr.bf16.mxu0 %v3550_v51 }
0x1a28   :  { %v3341_v36 = vpop.f32.mrb[18].mxu0 }
0x1a29   :  { %2397 = vrot.lane.b32.xlu1 %v3341_v36, %s4470_s3  ;;  %v2384_v19 = vpop.f32.mrb[19].mxu0 }
0x1a2a   :  { %2395 = vrot.lane.b32.xlu0 %v2384_v19, %s4470_s3 }
0x1a9b   :  { %v2398_v34 = vpop.permute.xlu1 %2397 }
0x1a9c   :  { %2402 = vst.msk [vmem:[#allocation2 + $0x8] sm:$0xff] %vm1098_vm10, %v2398_v34  ;;  %v2396_v20 = vpop.permute.xlu0 %2395  ;;  %v3005_v34 = vld [vmem:[%s4462_s30 + $0x1] ss:$0 sm:$0xff] }
0x1a9d   :  { %2401 = vst.msk [vmem:[#allocation2] sm:$0xff] %vm1098_vm10, %v2396_v20 }
0x1aa3   :  { %v2404_v44 = vld [vmem:[#allocation2 + $0x8] sm:$0xff] }
0x1aa4   :  { %v2403_v21 = vld [vmem:[#allocation2] sm:$0xff] }
0x1aa5   :  { %3350 = vmatprep.mubr.msk.f32.mxu0 %vm184_vm4, %v2403_v21 }
0x1aa6   :  { %3351 = vmatmul.mubr.msk.f32.vlgmr.msra.gmra.mrb[20].mxu0 %vm184_vm4, %v2404_v44 }
0x1aa7   :  { %3553 = vmatpush3.bf16.msra.mxu0 %v3550_v51  ;;  %v3010_v51 = vld [vmem:[%s4431_s14 + $0x1] ss:$0 sm:$0xff]  ;;  %s3795_s14 = smov [#allocation3]  }
0x1aa8   :  { %3555 = vmatprep.subr.bf16.mxu0 %v3554_v55  ;;  %s2888_s7 = sshll.u32 %s3795_s14, 4  ;;  %s2889_s7 = int_to_ptr.vmem [resolvable:$true] %s2888_s7 }
0x1aa9   :  { %s3755_s15 = scalar_lea.vmem %s2889_s7, 256  ;;  %p3760_p1 = scmp.lt.s32.totalorder %s2889_s7, %s2889_s7 }
0x1aaa   :  { %p3756_p0 = scmp.ne.s32.totalorder %s2889_s7, %s3755_s15  ;;  %p3761_p2 = scmp.lt.s32.totalorder %s3755_s15, %s3755_s15 }
0x1aab   :  { %3557 = vmatpush3.bf16.msra.mxu0 %v3554_v55 }
0x1aac   :  { %3559 = vmatprep.subr.bf16.mxu0 %v3558_v59  ;;  %p3762_p3 = por %p3761_p2, %p3760_p1 }
0x1aae   :  { %p3763_p4 = pnand %p3762_p3, %p3756_p0 }
0x1aaf   :  { %3561 = vmatpush3.bf16.msra.mxu0 %v3558_v59 }
0x1ab0   :  { %3563 = vmatprep.subr.bf16.mxu0 %v3562_v13 }
0x1ab3   :  { %3565 = vmatpush3.bf16.msra.mxu0 %v3562_v13 }
0x1b79   :  { %v3352_v43 = vpop.f32.mrb[20].mxu0 }
0x1b7a   :  { %v2496_v23 = vadd.f32 %v3352_v43, %v2981_v22  ;;  %v2490_v24 = vpop.f32.mrb[21].mxu0 }
0x1b7b   :  { %v2491_v25 = vadd.f32 %v2981_v22, %v2490_v24 }
0x1b7c   :  { %v2500_v31 = vadd.f32 %v2496_v23, %v4177_v53 }
0x1b7d   :  { %v2499_v30 = vadd.f32 %v2491_v25, %v4175_v52  ;;  %v2988_v52 = vld [vmem:[%s4425_s8 + $0x20] sm:$0xff] }
0x1b7e   :  { %v2508_v26 = vsel %vm184_vm4, %v2500_v31, 0.0  ;;  %v3542_v42 = vpack.c.bf16 %v2989_v40, %v2988_v52  ;;  %v2792_v52 = vld [vmem:[%s4433_s16 + $0x18] sm:$0xff] }
0x1b7f   :  { %2509 = vadd.xlane.f32.xlu1 %v2508_v26  ;;  %v2505_v27 = vsel %vm184_vm4, %v2499_v30, 0.0 }
0x1b80   :  { %2506 = vadd.xlane.f32.xlu0 %v2505_v27  ;;  %3543 = vmatprep.subr.bf16.mxu1 %v3542_v42 }
0x1b81   :  { %3545 = vmatpush3.bf16.msra.mxu1 %v3542_v42 }
0x1b82   :  { %3547 = vmatprep.subr.bf16.mxu1 %v3546_v47 }
0x1b85   :  { %3549 = vmatpush3.bf16.msra.mxu1 %v3546_v47 }
0x1c0c   :  { %v2510_v28 = vpop.xlane.xlu1 %2509 }
0x1c0d   :  { %v2512_v29 = vmul.f32 0.03125, %v2510_v28  ;;  %v2507_v32 = vpop.xlane.xlu0 %2506 }
0x1c0e   :  { %v2511_v57 = vmul.f32 0.03125, %v2507_v32 }
0x1c0f   :  { %v2514_v33 = vsub.f32 %v2500_v31, %v2512_v29 }
0x1c10   :  { %v2513_v56 = vsub.f32 %v2499_v30, %v2511_v57 }
0x1c11   :  { %v2516_v39 = vmul.f32 %v2514_v33, %v2514_v33 }
0x1c12   :  { %v2515_v35 = vmul.f32 %v2513_v56, %v2513_v56 }
0x1c13   :  { %v2520_v53 = vsel %vm184_vm4, %v2516_v39, 0.0 }
0x1c14   :  { %v2517_v38 = vsel %vm184_vm4, %v2515_v35, 0.0  ;;  %v2789_v35 = vld [vmem:[%s4433_s16] sm:$0xff] }
0x1c15   :  { %2518 = vadd.xlane.f32.xlu0 %v2517_v38  ;;  %v2790_v38 = vld [vmem:[%s4433_s16 + $0x8] sm:$0xff] }
0x1c16   :  { %v3566_v39 = vpack.c.bf16 %v2790_v38, %v2789_v35 }
0x1c18   :  { %3567 = vmatprep.subr.bf16.mxu1 %v3566_v39 }
0x1c19   :  { %2521 = vadd.xlane.f32.xlu0 %v2520_v53  ;;  %v2791_v53 = vld [vmem:[%s4433_s16 + $0x10] sm:$0xff] }
0x1c1a   :  { %v3570_v40 = vpack.c.bf16 %v2792_v52, %v2791_v53 }
0x1ca2   :  { %v2519_v60 = vpop.xlane.xlu0 %2518 }
0x1ca3   :  { %v2523_v61 = vmul.f32 0.03125, %v2519_v60 }
0x1ca5   :  { %v2525_v62 = vadd.f32 1e-05, %v2523_v61 }
0x1ca6   :  { %v2522_v63 = vpop.xlane.xlu0 %2521 }
0x1ca7   :  { %3745 = vrsqrt.f32 %v2525_v62  ;;  %v2524_v0 = vmul.f32 0.03125, %v2522_v63  ;;  %v3012_v63 = vld [vmem:[%s4434_s17] ss:$0 sm:$0xff] }
0x1ca9   :  { %v2526_v1 = vadd.f32 1e-05, %v2524_v0 }
0x1cab   :  { %3747 = vrsqrt.f32 %v2526_v1 }
0x1cb1   :  { %v3746_v2 = vpop.eup %3745 }
0x1cb2   :  { %v2529_v4 = vmul.f32 %v3746_v2, %v2513_v56 }
0x1cb4   :  { %v2537_v6 = vmul.f32 %v2986_v3, %v2529_v4 }
0x1cb5   :  { %v3748_v8 = vpop.eup %3747 }
0x1cb6   :  { %v2530_v7 = vmul.f32 %v3748_v8, %v2514_v33  ;;  %v2545_v58 = vadd.f32 %v2987_v5, %v2537_v6 }
0x1cb8   :  { %v2538_v9 = vmul.f32 %v2986_v3, %v2530_v7  ;;  %3361 = vmatprep.mubr.msk.f32.mxu1 %vm184_vm4, %v2545_v58 }
0x1cba   :  { %v2546_v10 = vadd.f32 %v2987_v5, %v2538_v9 }
0x1cbc   :  { %3362 = vmatmul.mubr.msk.f32.vlgmr.msra.gmra.mrb[24].mxu1 %vm184_vm4, %v2546_v10 }
0x1cbd   :  { %3569 = vmatpush3.bf16.msra.mxu1 %v3566_v39 }
0x1cbe   :  { %3571 = vmatprep.subr.bf16.mxu1 %v3570_v40 }
0x1cc1   :  { %3573 = vmatpush3.bf16.msra.mxu1 %v3570_v40 }
0x1d8f   :  { %v3363_v15 = vpop.f32.mrb[24].mxu1 }
0x1d90   :  { %v2638_v16 = vadd.f32 %v3363_v15, %v2993_v14  ;;  %v2632_v17 = vpop.f32.mrb[25].mxu1 }
0x1d91   :  { %v2633_v18 = vadd.f32 %v2993_v14, %v2632_v17 }
0x1d92   :  { %v2642_v19 = vmax.f32 %v2638_v16, 0.0 }
0x1d93   :  { %v2641_v36 = vmax.f32 %v2633_v18, 0.0 }
0x1d95   :  { %3380 = vmatprep.mubr.msk.f32.mxu0 %vm1351_vm11, %v2641_v36 }
0x1d96   :  { %3381 = vmatmul.mubr.msk.f32.vlgmr.msra.gmra.mrb[22].mxu0 %vm1351_vm11, %v2642_v19 }
0x1e69   :  { %v3382_v20 = vpop.f32.mrb[22].mxu0 }
0x1e6a   :  { %v2738_v21 = vadd.f32 %v3382_v20, %v3005_v34  ;;  %v2732_v44 = vpop.f32.mrb[23].mxu0 }
0x1e6b   :  { %v2733_v22 = vadd.f32 %v3005_v34, %v2732_v44 }
0x1e6c   :  { %v2742_v43 = vadd.f32 %v2738_v21, %v2546_v10 }
0x1e6d   :  { %v2741_v23 = vadd.f32 %v2733_v22, %v2545_v58 }
0x1e6e   :  { %v2750_v24 = vsel %vm184_vm4, %v2742_v43, 0.0 }
0x1e6f   :  { %2751 = vadd.xlane.f32.xlu0 %v2750_v24  ;;  %v2747_v25 = vsel %vm184_vm4, %v2741_v23, 0.0 }
0x1e70   :  { %2748 = vadd.xlane.f32.xlu1 %v2747_v25 }
0x1efc   :  { %v2752_v31 = vpop.xlane.xlu0 %2751 }
0x1efd   :  { %v2754_v30 = vmul.f32 0.03125, %v2752_v31  ;;  %v2749_v26 = vpop.xlane.xlu1 %2748 }
0x1efe   :  { %v2753_v27 = vmul.f32 0.03125, %v2749_v26 }
0x1eff   :  { %v2756_v28 = vsub.f32 %v2742_v43, %v2754_v30 }
0x1f00   :  { %v2755_v29 = vsub.f32 %v2741_v23, %v2753_v27 }
0x1f01   :  { %v2758_v32 = vmul.f32 %v2756_v28, %v2756_v28 }
0x1f02   :  { %v2757_v57 = vmul.f32 %v2755_v29, %v2755_v29 }
0x1f03   :  { %v2762_v33 = vsel %vm184_vm4, %v2758_v32, 0.0 }
0x1f04   :  { %2763 = vadd.xlane.f32.xlu0 %v2762_v33  ;;  %v2759_v56 = vsel %vm184_vm4, %v2757_v57, 0.0 }
0x1f05   :  { %2760 = vadd.xlane.f32.xlu1 %v2759_v56 }
0x1f91   :  { %v2764_v42 = vpop.xlane.xlu0 %2763 }
0x1f92   :  { %v2766_v45 = vmul.f32 0.03125, %v2764_v42  ;;  %v2761_v46 = vpop.xlane.xlu1 %2760 }
0x1f93   :  { %v2765_v47 = vmul.f32 0.03125, %v2761_v46 }
0x1f94   :  { %v2768_v48 = vadd.f32 1e-05, %v2766_v45 }
0x1f95   :  { %v2767_v49 = vadd.f32 1e-05, %v2765_v47 }
0x1f96   :  { %3749 = vrsqrt.f32 %v2768_v48 }
0x1f97   :  { %3751 = vrsqrt.f32 %v2767_v49 }
0x1fa0   :  { %v3750_v50 = vpop.eup %3749 }
0x1fa1   :  { %v3752_v54 = vpop.eup %3751  ;;  %v2772_v55 = vmul.f32 %v3750_v50, %v2756_v28 }
0x1fa2   :  { %v2771_v41 = vmul.f32 %v3752_v54, %v2755_v29 }
0x1fa3   :  { %v2780_v59 = vmul.f32 %v3010_v51, %v2772_v55 }
0x1fa4   :  { %v2779_v60 = vmul.f32 %v3010_v51, %v2771_v41 }
0x1fa5   :  { %v2788_v62 = vadd.f32 %v3011_v37, %v2780_v59 }
0x1fa6   :  { %v2787_v61 = vadd.f32 %v3011_v37, %v2779_v60 }
0x1fa8   :  { %3391 = vmatprep.mubr.msk.f32.mxu1 %vm184_vm4, %v2787_v61 }
0x1fa9   :  { %3392 = vmatmul.mubr.msk.f32.vlgmr.msra.gmra.mrb[26].mxu1 %vm184_vm4, %v2788_v62 }
0x207c   :  { %v3393_v0 = vpop.f32.mrb[26].mxu1 }
0x207d   :  { %v2878_v1 = vadd.f32 %v3393_v0, %v3012_v63  ;;  %v2872_v2 = vpop.f32.mrb[27].mxu1 }
0x207e   :  { %v2873_v3 = vadd.f32 %v3012_v63, %v2872_v2 }
0x207f   :  { %2882 = vst [vmem:[#allocation3 + $0x8] sm:$0xff] %v2878_v1 }
0x2080   :  { %2881 = vst [vmem:[#allocation3] sm:$0xff] %v2873_v3 }
0x2081   :  { %3766 = shalt.err (!%p3763_p4)
}
0x2082   :  { %s3767_s17 = scalar_lea.hbm %s4435_s18, 256 }
0x2083   :  { %p3768_p5 = scmp.ne.s32.totalorder %s4435_s18, %s3767_s17  ;;  %p3771_p6 = scmp.lt.u32.totalorder %s3767_s17, %s4435_s18 }
0x2085   :  { %p3773_p7 = pnand %p3771_p6, %p3768_p5 }
0x2087   :  { %3776 = shalt.err (!%p3773_p7)
}
0x2088   :  { %s3796_s27 = smov 128  }
0x2089   :  { %2894 = dma.vmem_to_hbm [thread:$0]  %s2889_s7, 256, %s4435_s18, [#allocation4], %s3796_s27, %s3796_s27, %s4467_s26  }
0x208a   :  { %3777 = dma.done.wait [#allocation4], 256  }
0x208b   :  { %3778 = vsyncadd [#allocation4], 4294967040 }
0x208c   :  { %2898 = vsyncpa [#allocation4], 1 }

</bundles_post_ra>
